<compile_context>
chip_gen: v7x
topology: tpu7x:2x2x1
jax: 0.10.0
libtpu: 0.0.40
codegen_flags: <defaults>
</compile_context>

<pallas_src>
import functools

import jax
import jax.numpy as jnp
from jax.experimental import pallas as pl
from jax.experimental.pallas import tpu as pltpu


_PERM = (1, 3, 5, 7, 0, 2, 4, 6)   # (parity-major) reordering of 8 rows/cols


# ----------------------------- Pallas kernels -----------------------------

def _backbone_kernel(z1_ref, w1_ref, w2_ref, o_ref, z2_ref, *, Nh, C1):
    """Fused Conv-2 backbone: [conv3x3(same)+BN(folded)+ReLU+maxpool2x2] x 2.

    z1_ref: [1, 4, 8*Nh, 9*8*Cin] layer-1 im2col, one K-stacked matrix per 2x2
                                   pool parity; rows ordered
                                   (row-parity, pooled-row, image)       (bf16)
    w1_ref: [9*8*Cin, 8*C1]       layer-1 block-diagonal weights         (bf16)
    w2_ref: [2, 9, 4*C1, 4*C2]    layer-2 shifted block-diag weights,
                                   indexed [pool-col-parity, tap]        (bf16)
    o_ref : [1, 4*Nh, 4*C2]       pooled layer-2 output, rows (i2, image)(bf16)
    z2_ref: [2, 2, 5*Nh, 4*C1]    VMEM scratch: layer-1 output split by
                                   (row parity, col parity), zero halo rows.
    """
    h = 4 * Nh

    # ---- layer 1: one K=216 matmul per pool parity (M = 8*Nh rows) ----
    w1 = w1_ref[...]
    a = [jnp.dot(z1_ref[0, pq], w1, preferred_element_type=jnp.float32)
         for pq in range(4)]
    a1 = jnp.maximum(jnp.maximum(a[0], a[1]), jnp.maximum(a[2], a[3]))
    a1 = jnp.maximum(a1, 0.0)                 # ReLU commutes with the max
    a1 = a1.astype(jnp.bfloat16)              # MXU operand for layer 2

    # ---- relayout into layer-2 scratch (all stores lane-offset 0) ----
    z2_ref[...] = jnp.zeros(z2_ref.shape, z2_ref.dtype)   # zero halo rows
    # rows 0:h of a1 = odd layer-1 output rows, h:2h = even rows;
    # lanes 0:4*C1 = odd layer-1 output columns, 4*C1:8*C1 = even columns
    # (host built z1 / w1 in exactly this order).
    z2_ref[0, 0, Nh:5 * Nh, :] = a1[0:h, 0:4 * C1]
    z2_ref[0, 1, Nh:5 * Nh, :] = a1[0:h, 4 * C1:8 * C1]
    z2_ref[1, 0, 0:h, :] = a1[h:2 * h, 0:4 * C1]
    z2_ref[1, 1, 0:h, :] = a1[h:2 * h, 4 * C1:8 * C1]

    # ---- layer 2: 36 matmuls (M = 4*Nh, K = 4*C1); column halo folded into
    #      the shifted weights, row halo provided by the zero row blocks. ----
    sl = {}
    for rp in range(2):            # row-parity plane
        for cp in range(2):        # col-parity plane
            for off in range(2):   # row-block offset
                sl[(rp, cp, off)] = z2_ref[rp, cp, off * Nh:off * Nh + h, :]
    wl = {(q2, k): w2_ref[q2, k] for q2 in range(2) for k in range(9)}

    acc = []
    for p2 in range(2):
        for q2 in range(2):
            s = None
            for k in range(9):
                dh, dw = k // 3, k % 3
                rh, rw = p2 + dh, q2 + dw
                d = jnp.dot(sl[(rh % 2, rw % 2, rh // 2)], wl[(q2, k)],
                            preferred_element_type=jnp.float32)
                s = d if s is None else s + d
            acc.append(s)
    pooled = jnp.maximum(jnp.maximum(acc[0], acc[1]),
                         jnp.maximum(acc[2], acc[3]))
    o_ref[0] = jnp.maximum(pooled, 0.0).astype(o_ref.dtype)


def _protodist_kernel(s_ref, q_ref, o_ref):
    """Prototype mean + negative squared euclidean distance (direct form).

    s_ref: [C_pad, Ns, D] support features (zero-padded classes)
    q_ref: [Q_pad, D]     query features (zero-padded rows)
    o_ref: [Q_pad, C_pad] -||q - proto||^2  (structurally <= 0)
    """
    protos = jnp.mean(s_ref[...], axis=1)            # [C_pad, D]
    q = q_ref[...]                                    # [Q_pad, D]
    diff = q[:, None, :] - protos[None, :, :]         # [Q_pad, C_pad, D]
    o_ref[...] = -jnp.sum(diff * diff, axis=-1)


# ----------------------------- host-side glue -----------------------------

def _build_z1(xp, cin):
    """xp: [G, Nh, 18, 18, Cin] zero-bordered images -> layer-1 im2col.

    Returns [G, 4, 8*Nh, 9*8*Cin] bf16: one K-stacked matrix per 2x2 pool
    parity; rows ordered (row-parity, pooled-row, image), K ordered
    (tap, output-column-group, cin).
    """
    g, nh = xp.shape[0], xp.shape[1]
    # slabs[rh][rw][gs, n, i, j, c] = xp[gs, n, 2*i + rh, 2*j + rw, c]
    slabs = [[xp[:, :, rh:rh + 16:2, rw:rw + 16:2, :] for rw in range(4)]
             for rh in range(4)]
    perm = jnp.array(_PERM)
    zs = []
    for p in range(2):
        for q in range(2):
            taps = [slabs[p + dh][q + dw] for dh in range(3) for dw in range(3)]
            zs.append(jnp.stack(taps, axis=3))       # [G, Nh, 8, 9, 8, Cin]
    z = jnp.stack(zs, axis=1)                        # [G, 4, Nh, 8, 9, 8, Cin]
    z = jnp.take(z, perm, axis=3)                    # rows -> (parity, i'')
    z = jnp.take(z, perm, axis=5)                    # cols -> (parity, j'')
    z = jnp.transpose(z, (0, 1, 3, 2, 4, 5, 6))      # [G, 4, 8, Nh, 9, 8, Cin]
    return z.reshape(g, 4, 8 * nh, 9 * 8 * cin).astype(jnp.bfloat16)


def _layer1_weights(w1):
    """[3,3,Cin,C1] -> [9*8*Cin, 8*C1] block-diagonal weights (one block per
    output column group); group g corresponds to output column _PERM[g]."""
    cin, c1 = w1.shape[2], w1.shape[3]
    w1f = w1.reshape(9, cin, c1)
    eye = jnp.eye(8, dtype=w1.dtype)
    w = jnp.einsum('gh,kio->kgiho', eye, w1f)        # [9, 8, Cin, 8, C1]
    return w.reshape(9 * 8 * cin, 8 * c1).astype(jnp.bfloat16)


def _layer2_weights(w2):
    """[3,3,C1,C2] -> [2, 9, 4*C1, 4*C2] shifted block-diagonal weights.

    Indexed [pool-col-parity q2, tap]; the block shift selects the layer-1
    column the tap reads within its parity plane and absorbs the left/right
    zero halo of the 'same' convolution.
    """
    c1, c2 = w2.shape[2], w2.shape[3]
    w2f = w2.reshape(9, c1, c2)
    delta_of_rw = {0: -1, 1: 0, 2: 0, 3: 1}
    mats = []
    for q2 in range(2):
        per_tap = []
        for k in range(9):
            dw = k % 3
            delta = delta_of_rw[q2 + dw]
            eye = jnp.eye(4, k=-delta, dtype=w2.dtype)
            blk = jnp.einsum('mj,io->mijo', eye, w2f[k]).reshape(4 * c1, 4 * c2)
            per_tap.append(blk)
        mats.append(jnp.stack(per_tap))
    return jnp.stack(mats).astype(jnp.bfloat16)      # [2, 9, 4*C1, 4*C2]


def backbone_features(x_nhwc, params):
    """Fused Conv-2 backbone; returns flattened features [N, 16*C2] (bf16)."""
    w1, w2 = params
    n, hgt, wid, cin = x_nhwc.shape
    assert hgt == 16 and wid == 16, "kernel layout specialized to 16x16 input"
    c1, c2 = w1.shape[3], w2.shape[3]

    g = 2                                        # one grid step per v7x TC
    n_pad = ((n + 2 * g - 1) // (2 * g)) * (2 * g)   # images/step stays even
    nh = n_pad // g

    # TODO(synk): MAX_BATCH_SIZE=500 minibatch splitting is a no-op at these shapes.
    x = jnp.pad(x_nhwc, ((0, n_pad - n), (1, 1), (1, 1), (0, 0)))
    xp = x.reshape(g, nh, hgt + 2, wid + 2, cin)
    z1 = _build_z1(xp, cin)                      # [g, 4, 8*nh, 9*8*cin]
    w1cat = _layer1_weights(w1)                  # [9*8*cin, 8*c1]
    w2s = _layer2_weights(w2)                    # [2, 9, 4*c1, 4*c2]

    kernel = functools.partial(_backbone_kernel, Nh=nh, C1=c1)
    out = pl.pallas_call(
        kernel,
        out_shape=jax.ShapeDtypeStruct((g, 4 * nh, 4 * c2), jnp.bfloat16),
        grid=(g,),
        in_specs=[
            pl.BlockSpec((1, 4, 8 * nh, z1.shape[-1]), lambda i: (i, 0, 0, 0)),
            pl.BlockSpec(w1cat.shape, lambda i: (0, 0)),
            pl.BlockSpec(w2s.shape, lambda i: (0, 0, 0, 0)),
        ],
        out_specs=pl.BlockSpec((1, 4 * nh, 4 * c2), lambda i: (i, 0, 0)),
        scratch_shapes=[pltpu.VMEM((2, 2, 5 * nh, 4 * c1), jnp.bfloat16)],
        compiler_params=pltpu.CompilerParams(
            dimension_semantics=("parallel",)),
    )(z1, w1cat, w2s)

    # output rows are (i2, image); regroup to per-image flattened features
    feats = out.reshape(g, 4, nh, 4 * c2).transpose(0, 2, 1, 3)
    feats = feats.reshape(g * nh, 16 * c2)
    return feats[:n]


def proto_neg_sq_dist(support_feats, query_feats):
    """support_feats: [Nc, Ns, D], query_feats: [Nq, D] -> [Nq, Nc]."""
    nc, ns, d = support_feats.shape
    nq = query_feats.shape[0]
    c_pad = max(8, ((nc + 7) // 8) * 8)
    q_pad = max(8, ((nq + 7) // 8) * 8)
    sup = jnp.pad(support_feats.astype(jnp.float32),
                  ((0, c_pad - nc), (0, 0), (0, 0)))
    qry = jnp.pad(query_feats.astype(jnp.float32), ((0, q_pad - nq), (0, 0)))
    out = pl.pallas_call(
        _protodist_kernel,
        out_shape=jax.ShapeDtypeStruct((q_pad, c_pad), jnp.float32),
    )(sup, qry)
    return out[:nq, :nc]


@jax.jit
def protonet_forward(support_nchw, query_nchw, params):
    """support: [n_classes, n_support, C, H, W]; query: [n_query, C, H, W]."""
    nc, ns = support_nchw.shape[:2]
    sup = support_nchw.reshape((nc * ns,) + support_nchw.shape[2:])  # remove_dim
    batch = jnp.concatenate([sup, query_nchw], axis=0)   # one backbone pass
    batch = jnp.transpose(batch, (0, 2, 3, 1))            # NCHW -> NHWC
    feats = backbone_features(batch, params)
    sup_feats = feats[:nc * ns].reshape(nc, ns, -1)
    qry_feats = feats[nc * ns:]
    return proto_neg_sq_dist(sup_feats, qry_feats)


# ----------------------------- params -----------------------------

def init_params(key, c_in=3, c1=16, c2=32):
    """Deterministic synthetic params matching the module's __init__ rules."""
    k1, k2 = jax.random.split(key)
    # Kaiming normal, mode='fan_in', gain('conv2d')=1 -> std = 1/sqrt(9*Cin);
    # conv bias = 0.
    w1 = jax.random.normal(k1, (3, 3, c_in, c1), jnp.float32) / jnp.sqrt(9.0 * c_in)
    w2 = jax.random.normal(k2, (3, 3, c1, c2), jnp.float32) / jnp.sqrt(9.0 * c1)
    # Fold eval-mode BN (gamma=1, beta=0, running mean=0, var=1) into the conv
    # weights: per-channel scale = 1/sqrt(1+eps), shift = 0.
    # TODO(synk): training-mode BatchNorm (batch statistics) not implemented;
    # eval-mode BN with default running stats is folded instead.
    eps = 1e-5
    bn_scale = 1.0 / jnp.sqrt(1.0 + eps)
    return (w1 * bn_scale, w2 * bn_scale)


# ----------------------------- main -----------------------------

if __name__ == "__main__":
    key = jax.random.PRNGKey(0)
    k_par, k_sup, k_qry = jax.random.split(key, 3)

    n_classes, n_support, n_query = 3, 2, 4
    c_in, h, w = 3, 16, 16

    params = init_params(k_par, c_in=c_in, c1=16, c2=32)
    support = jax.random.normal(k_sup, (n_classes, n_support, c_in, h, w),
                                jnp.float32)
    query = jax.random.normal(k_qry, (n_query, c_in, h, w), jnp.float32)

    logits = protonet_forward(support, query, params)   # [n_query, n_classes]
    jax.block_until_ready(logits)
    assert logits.shape == (n_query, n_classes)
    assert bool(jnp.all(logits <= 0.0))   # negative squared distances
    print("KERNEL_OK")
</pallas_src>

<mosaic_0001>
module attributes {stable_mosaic.version = 11 : i64} {
  func.func @_backbone_kernel(%arg0: i32, %arg1: memref<1x4x48x216xbf16, #tpu.memory_space<vmem>>, %arg2: memref<216x128xbf16, #tpu.memory_space<vmem>>, %arg3: memref<2x9x64x128xbf16, #tpu.memory_space<vmem>>, %arg4: memref<1x24x128xbf16, #tpu.memory_space<vmem>>, %arg5: memref<2x2x30x64xbf16, #tpu.memory_space<vmem>>) attributes {dimension_semantics = [#tpu.dimension_semantics<parallel>], iteration_bounds = array<i64: 2>, scalar_prefetch = 0 : i64, scratch_operands = 1 : i64, tpu.core_type = #tpu.core_type<tc>, window_params = [{transform_indices = @transform_0, window_bounds = array<i64: 1, 4, 48, 216>}, {pipeline_mode = #tpu.pipeline_mode<synchronous>, transform_indices = @transform_1, window_bounds = array<i64: 216, 128>}, {pipeline_mode = #tpu.pipeline_mode<synchronous>, transform_indices = @transform_2, window_bounds = array<i64: 2, 9, 64, 128>}, {transform_indices = @transform_3, window_bounds = array<i64: 1, 24, 128>}]} {
    %c0 = arith.constant 0 : index
    %c0_0 = arith.constant 0 : index
    %0 = vector.load %arg2[%c0, %c0_0] : memref<216x128xbf16, #tpu.memory_space<vmem>>, vector<216x128xbf16>
    %c0_1 = arith.constant 0 : index
    %c0_2 = arith.constant 0 : index
    %c0_3 = arith.constant 0 : index
    %c0_4 = arith.constant 0 : index
    %1 = vector.load %arg1[%c0_1, %c0_2, %c0_3, %c0_4] : memref<1x4x48x216xbf16, #tpu.memory_space<vmem>>, vector<1x1x48x216xbf16>
    %2 = vector.shape_cast %1 : vector<1x1x48x216xbf16> to vector<48x216xbf16>
    %cst = arith.constant dense<0.000000e+00> : vector<48x128xf32>
    %3 = tpu.matmul %2, %0, %cst {dimension_numbers = #tpu.dot_dimension_numbers<[1], [0], [0], [1], [0, 0, 1, 1], [], []>} : vector<48x216xbf16>, vector<216x128xbf16>, vector<48x128xf32> -> vector<48x128xf32>
    %c0_5 = arith.constant 0 : index
    %c1 = arith.constant 1 : index
    %c0_6 = arith.constant 0 : index
    %c0_7 = arith.constant 0 : index
    %4 = vector.load %arg1[%c0_5, %c1, %c0_6, %c0_7] : memref<1x4x48x216xbf16, #tpu.memory_space<vmem>>, vector<1x1x48x216xbf16>
    %5 = vector.shape_cast %4 : vector<1x1x48x216xbf16> to vector<48x216xbf16>
    %cst_8 = arith.constant dense<0.000000e+00> : vector<48x128xf32>
    %6 = tpu.matmul %5, %0, %cst_8 {dimension_numbers = #tpu.dot_dimension_numbers<[1], [0], [0], [1], [0, 0, 1, 1], [], []>} : vector<48x216xbf16>, vector<216x128xbf16>, vector<48x128xf32> -> vector<48x128xf32>
    %c0_9 = arith.constant 0 : index
    %c2 = arith.constant 2 : index
    %c0_10 = arith.constant 0 : index
    %c0_11 = arith.constant 0 : index
    %7 = vector.load %arg1[%c0_9, %c2, %c0_10, %c0_11] : memref<1x4x48x216xbf16, #tpu.memory_space<vmem>>, vector<1x1x48x216xbf16>
    %8 = vector.shape_cast %7 : vector<1x1x48x216xbf16> to vector<48x216xbf16>
    %cst_12 = arith.constant dense<0.000000e+00> : vector<48x128xf32>
    %9 = tpu.matmul %8, %0, %cst_12 {dimension_numbers = #tpu.dot_dimension_numbers<[1], [0], [0], [1], [0, 0, 1, 1], [], []>} : vector<48x216xbf16>, vector<216x128xbf16>, vector<48x128xf32> -> vector<48x128xf32>
    %c0_13 = arith.constant 0 : index
    %c3 = arith.constant 3 : index
    %c0_14 = arith.constant 0 : index
    %c0_15 = arith.constant 0 : index
    %10 = vector.load %arg1[%c0_13, %c3, %c0_14, %c0_15] : memref<1x4x48x216xbf16, #tpu.memory_space<vmem>>, vector<1x1x48x216xbf16>
    %11 = vector.shape_cast %10 : vector<1x1x48x216xbf16> to vector<48x216xbf16>
    %cst_16 = arith.constant dense<0.000000e+00> : vector<48x128xf32>
    %12 = tpu.matmul %11, %0, %cst_16 {dimension_numbers = #tpu.dot_dimension_numbers<[1], [0], [0], [1], [0, 0, 1, 1], [], []>} : vector<48x216xbf16>, vector<216x128xbf16>, vector<48x128xf32> -> vector<48x128xf32>
    %13 = arith.maximumf %3, %6 : vector<48x128xf32>
    %14 = arith.maximumf %9, %12 : vector<48x128xf32>
    %15 = arith.maximumf %13, %14 : vector<48x128xf32>
    %cst_17 = arith.constant 0.000000e+00 : f32
    %16 = vector.broadcast %cst_17 : f32 to vector<48x128xf32>
    %17 = arith.maximumf %15, %16 : vector<48x128xf32>
    %18 = arith.truncf %17 : vector<48x128xf32> to vector<48x128xbf16>
    %cst_18 = arith.constant 0.000000e+00 : bf16
    %19 = vector.broadcast %cst_18 : bf16 to vector<2x2x30x64xbf16>
    %c0_19 = arith.constant 0 : index
    %c0_20 = arith.constant 0 : index
    %c0_21 = arith.constant 0 : index
    %c0_22 = arith.constant 0 : index
    %20 = vector.load %arg5[%c0_19, %c0_20, %c0_21, %c0_22] : memref<2x2x30x64xbf16, #tpu.memory_space<vmem>>, vector<2x2x30x64xbf16>
    tpu.vector_store %arg5[%c0_19, %c0_20, %c0_21, %c0_22], %19 {strides = array<i32>} : memref<2x2x30x64xbf16, #tpu.memory_space<vmem>>, vector<2x2x30x64xbf16>,
    %21 = vector.extract_strided_slice %18 {offsets = [0, 0], sizes = [24, 64], strides = [1, 1]} : vector<48x128xbf16> to vector<24x64xbf16>
    %c0_23 = arith.constant 0 : index
    %c0_24 = arith.constant 0 : index
    %c6 = arith.constant 6 : index
    %c0_25 = arith.constant 0 : index
    %22 = vector.load %arg5[%c0_23, %c0_24, %c6, %c0_25] : memref<2x2x30x64xbf16, #tpu.memory_space<vmem>>, vector<1x1x24x64xbf16>
    %23 = vector.shape_cast %22 : vector<1x1x24x64xbf16> to vector<24x64xbf16>
    %24 = vector.shape_cast %21 : vector<24x64xbf16> to vector<1x1x24x64xbf16>
    tpu.vector_store %arg5[%c0_23, %c0_24, %c6, %c0_25], %24 {strides = array<i32>} : memref<2x2x30x64xbf16, #tpu.memory_space<vmem>>, vector<1x1x24x64xbf16>,
    %25 = vector.extract_strided_slice %18 {offsets = [0, 64], sizes = [24, 64], strides = [1, 1]} : vector<48x128xbf16> to vector<24x64xbf16>
    %c0_26 = arith.constant 0 : index
    %c1_27 = arith.constant 1 : index
    %c6_28 = arith.constant 6 : index
    %c0_29 = arith.constant 0 : index
    %26 = vector.load %arg5[%c0_26, %c1_27, %c6_28, %c0_29] : memref<2x2x30x64xbf16, #tpu.memory_space<vmem>>, vector<1x1x24x64xbf16>
    %27 = vector.shape_cast %26 : vector<1x1x24x64xbf16> to vector<24x64xbf16>
    %28 = vector.shape_cast %25 : vector<24x64xbf16> to vector<1x1x24x64xbf16>
    tpu.vector_store %arg5[%c0_26, %c1_27, %c6_28, %c0_29], %28 {strides = array<i32>} : memref<2x2x30x64xbf16, #tpu.memory_space<vmem>>, vector<1x1x24x64xbf16>,
    %29 = vector.extract_strided_slice %18 {offsets = [24, 0], sizes = [24, 64], strides = [1, 1]} : vector<48x128xbf16> to vector<24x64xbf16>
    %c1_30 = arith.constant 1 : index
    %c0_31 = arith.constant 0 : index
    %c0_32 = arith.constant 0 : index
    %c0_33 = arith.constant 0 : index
    %30 = vector.load %arg5[%c1_30, %c0_31, %c0_32, %c0_33] : memref<2x2x30x64xbf16, #tpu.memory_space<vmem>>, vector<1x1x24x64xbf16>
    %31 = vector.shape_cast %30 : vector<1x1x24x64xbf16> to vector<24x64xbf16>
    %32 = vector.shape_cast %29 : vector<24x64xbf16> to vector<1x1x24x64xbf16>
    tpu.vector_store %arg5[%c1_30, %c0_31, %c0_32, %c0_33], %32 {strides = array<i32>} : memref<2x2x30x64xbf16, #tpu.memory_space<vmem>>, vector<1x1x24x64xbf16>,
    %33 = vector.extract_strided_slice %18 {offsets = [24, 64], sizes = [24, 64], strides = [1, 1]} : vector<48x128xbf16> to vector<24x64xbf16>
    %c1_34 = arith.constant 1 : index
    %c1_35 = arith.constant 1 : index
    %c0_36 = arith.constant 0 : index
    %c0_37 = arith.constant 0 : index
    %34 = vector.load %arg5[%c1_34, %c1_35, %c0_36, %c0_37] : memref<2x2x30x64xbf16, #tpu.memory_space<vmem>>, vector<1x1x24x64xbf16>
    %35 = vector.shape_cast %34 : vector<1x1x24x64xbf16> to vector<24x64xbf16>
    %36 = vector.shape_cast %33 : vector<24x64xbf16> to vector<1x1x24x64xbf16>
    tpu.vector_store %arg5[%c1_34, %c1_35, %c0_36, %c0_37], %36 {strides = array<i32>} : memref<2x2x30x64xbf16, #tpu.memory_space<vmem>>, vector<1x1x24x64xbf16>,
    %c0_38 = arith.constant 0 : index
    %c0_39 = arith.constant 0 : index
    %c0_40 = arith.constant 0 : index
    %c0_41 = arith.constant 0 : index
    %37 = vector.load %arg5[%c0_38, %c0_39, %c0_40, %c0_41] : memref<2x2x30x64xbf16, #tpu.memory_space<vmem>>, vector<1x1x24x64xbf16>
    %38 = vector.shape_cast %37 : vector<1x1x24x64xbf16> to vector<24x64xbf16>
    %c0_42 = arith.constant 0 : index
    %c0_43 = arith.constant 0 : index
    %c6_44 = arith.constant 6 : index
    %c0_45 = arith.constant 0 : index
    %39 = vector.load %arg5[%c0_42, %c0_43, %c6_44, %c0_45] : memref<2x2x30x64xbf16, #tpu.memory_space<vmem>>, vector<1x1x24x64xbf16>
    %40 = vector.shape_cast %39 : vector<1x1x24x64xbf16> to vector<24x64xbf16>
    %c0_46 = arith.constant 0 : index
    %c1_47 = arith.constant 1 : index
    %c0_48 = arith.constant 0 : index
    %c0_49 = arith.constant 0 : index
    %41 = vector.load %arg5[%c0_46, %c1_47, %c0_48, %c0_49] : memref<2x2x30x64xbf16, #tpu.memory_space<vmem>>, vector<1x1x24x64xbf16>
    %42 = vector.shape_cast %41 : vector<1x1x24x64xbf16> to vector<24x64xbf16>
    %c0_50 = arith.constant 0 : index
    %c1_51 = arith.constant 1 : index
    %c6_52 = arith.constant 6 : index
    %c0_53 = arith.constant 0 : index
    %43 = vector.load %arg5[%c0_50, %c1_51, %c6_52, %c0_53] : memref<2x2x30x64xbf16, #tpu.memory_space<vmem>>, vector<1x1x24x64xbf16>
    %44 = vector.shape_cast %43 : vector<1x1x24x64xbf16> to vector<24x64xbf16>
    %c1_54 = arith.constant 1 : index
    %c0_55 = arith.constant 0 : index
    %c0_56 = arith.constant 0 : index
    %c0_57 = arith.constant 0 : index
    %45 = vector.load %arg5[%c1_54, %c0_55, %c0_56, %c0_57] : memref<2x2x30x64xbf16, #tpu.memory_space<vmem>>, vector<1x1x24x64xbf16>
    %46 = vector.shape_cast %45 : vector<1x1x24x64xbf16> to vector<24x64xbf16>
    %c1_58 = arith.constant 1 : index
    %c0_59 = arith.constant 0 : index
    %c6_60 = arith.constant 6 : index
    %c0_61 = arith.constant 0 : index
    %47 = vector.load %arg5[%c1_58, %c0_59, %c6_60, %c0_61] : memref<2x2x30x64xbf16, #tpu.memory_space<vmem>>, vector<1x1x24x64xbf16>
    %48 = vector.shape_cast %47 : vector<1x1x24x64xbf16> to vector<24x64xbf16>
    %c1_62 = arith.constant 1 : index
    %c1_63 = arith.constant 1 : index
    %c0_64 = arith.constant 0 : index
    %c0_65 = arith.constant 0 : index
    %49 = vector.load %arg5[%c1_62, %c1_63, %c0_64, %c0_65] : memref<2x2x30x64xbf16, #tpu.memory_space<vmem>>, vector<1x1x24x64xbf16>
    %50 = vector.shape_cast %49 : vector<1x1x24x64xbf16> to vector<24x64xbf16>
    %c1_66 = arith.constant 1 : index
    %c1_67 = arith.constant 1 : index
    %c6_68 = arith.constant 6 : index
    %c0_69 = arith.constant 0 : index
    %51 = vector.load %arg5[%c1_66, %c1_67, %c6_68, %c0_69] : memref<2x2x30x64xbf16, #tpu.memory_space<vmem>>, vector<1x1x24x64xbf16>
    %52 = vector.shape_cast %51 : vector<1x1x24x64xbf16> to vector<24x64xbf16>
    %c0_70 = arith.constant 0 : index
    %c0_71 = arith.constant 0 : index
    %c0_72 = arith.constant 0 : index
    %c0_73 = arith.constant 0 : index
    %53 = vector.load %arg3[%c0_70, %c0_71, %c0_72, %c0_73] : memref<2x9x64x128xbf16, #tpu.memory_space<vmem>>, vector<1x1x64x128xbf16>
    %54 = vector.shape_cast %53 : vector<1x1x64x128xbf16> to vector<64x128xbf16>
    %c0_74 = arith.constant 0 : index
    %c1_75 = arith.constant 1 : index
    %c0_76 = arith.constant 0 : index
    %c0_77 = arith.constant 0 : index
    %55 = vector.load %arg3[%c0_74, %c1_75, %c0_76, %c0_77] : memref<2x9x64x128xbf16, #tpu.memory_space<vmem>>, vector<1x1x64x128xbf16>
    %56 = vector.shape_cast %55 : vector<1x1x64x128xbf16> to vector<64x128xbf16>
    %c0_78 = arith.constant 0 : index
    %c2_79 = arith.constant 2 : index
    %c0_80 = arith.constant 0 : index
    %c0_81 = arith.constant 0 : index
    %57 = vector.load %arg3[%c0_78, %c2_79, %c0_80, %c0_81] : memref<2x9x64x128xbf16, #tpu.memory_space<vmem>>, vector<1x1x64x128xbf16>
    %58 = vector.shape_cast %57 : vector<1x1x64x128xbf16> to vector<64x128xbf16>
    %c0_82 = arith.constant 0 : index
    %c3_83 = arith.constant 3 : index
    %c0_84 = arith.constant 0 : index
    %c0_85 = arith.constant 0 : index
    %59 = vector.load %arg3[%c0_82, %c3_83, %c0_84, %c0_85] : memref<2x9x64x128xbf16, #tpu.memory_space<vmem>>, vector<1x1x64x128xbf16>
    %60 = vector.shape_cast %59 : vector<1x1x64x128xbf16> to vector<64x128xbf16>
    %c0_86 = arith.constant 0 : index
    %c4 = arith.constant 4 : index
    %c0_87 = arith.constant 0 : index
    %c0_88 = arith.constant 0 : index
    %61 = vector.load %arg3[%c0_86, %c4, %c0_87, %c0_88] : memref<2x9x64x128xbf16, #tpu.memory_space<vmem>>, vector<1x1x64x128xbf16>
    %62 = vector.shape_cast %61 : vector<1x1x64x128xbf16> to vector<64x128xbf16>
    %c0_89 = arith.constant 0 : index
    %c5 = arith.constant 5 : index
    %c0_90 = arith.constant 0 : index
    %c0_91 = arith.constant 0 : index
    %63 = vector.load %arg3[%c0_89, %c5, %c0_90, %c0_91] : memref<2x9x64x128xbf16, #tpu.memory_space<vmem>>, vector<1x1x64x128xbf16>
    %64 = vector.shape_cast %63 : vector<1x1x64x128xbf16> to vector<64x128xbf16>
    %c0_92 = arith.constant 0 : index
    %c6_93 = arith.constant 6 : index
    %c0_94 = arith.constant 0 : index
    %c0_95 = arith.constant 0 : index
    %65 = vector.load %arg3[%c0_92, %c6_93, %c0_94, %c0_95] : memref<2x9x64x128xbf16, #tpu.memory_space<vmem>>, vector<1x1x64x128xbf16>
    %66 = vector.shape_cast %65 : vector<1x1x64x128xbf16> to vector<64x128xbf16>
    %c0_96 = arith.constant 0 : index
    %c7 = arith.constant 7 : index
    %c0_97 = arith.constant 0 : index
    %c0_98 = arith.constant 0 : index
    %67 = vector.load %arg3[%c0_96, %c7, %c0_97, %c0_98] : memref<2x9x64x128xbf16, #tpu.memory_space<vmem>>, vector<1x1x64x128xbf16>
    %68 = vector.shape_cast %67 : vector<1x1x64x128xbf16> to vector<64x128xbf16>
    %c0_99 = arith.constant 0 : index
    %c8 = arith.constant 8 : index
    %c0_100 = arith.constant 0 : index
    %c0_101 = arith.constant 0 : index
    %69 = vector.load %arg3[%c0_99, %c8, %c0_100, %c0_101] : memref<2x9x64x128xbf16, #tpu.memory_space<vmem>>, vector<1x1x64x128xbf16>
    %70 = vector.shape_cast %69 : vector<1x1x64x128xbf16> to vector<64x128xbf16>
    %c1_102 = arith.constant 1 : index
    %c0_103 = arith.constant 0 : index
    %c0_104 = arith.constant 0 : index
    %c0_105 = arith.constant 0 : index
    %71 = vector.load %arg3[%c1_102, %c0_103, %c0_104, %c0_105] : memref<2x9x64x128xbf16, #tpu.memory_space<vmem>>, vector<1x1x64x128xbf16>
    %72 = vector.shape_cast %71 : vector<1x1x64x128xbf16> to vector<64x128xbf16>
    %c1_106 = arith.constant 1 : index
    %c1_107 = arith.constant 1 : index
    %c0_108 = arith.constant 0 : index
    %c0_109 = arith.constant 0 : index
    %73 = vector.load %arg3[%c1_106, %c1_107, %c0_108, %c0_109] : memref<2x9x64x128xbf16, #tpu.memory_space<vmem>>, vector<1x1x64x128xbf16>
    %74 = vector.shape_cast %73 : vector<1x1x64x128xbf16> to vector<64x128xbf16>
    %c1_110 = arith.constant 1 : index
    %c2_111 = arith.constant 2 : index
    %c0_112 = arith.constant 0 : index
    %c0_113 = arith.constant 0 : index
    %75 = vector.load %arg3[%c1_110, %c2_111, %c0_112, %c0_113] : memref<2x9x64x128xbf16, #tpu.memory_space<vmem>>, vector<1x1x64x128xbf16>
    %76 = vector.shape_cast %75 : vector<1x1x64x128xbf16> to vector<64x128xbf16>
    %c1_114 = arith.constant 1 : index
    %c3_115 = arith.constant 3 : index
    %c0_116 = arith.constant 0 : index
    %c0_117 = arith.constant 0 : index
    %77 = vector.load %arg3[%c1_114, %c3_115, %c0_116, %c0_117] : memref<2x9x64x128xbf16, #tpu.memory_space<vmem>>, vector<1x1x64x128xbf16>
    %78 = vector.shape_cast %77 : vector<1x1x64x128xbf16> to vector<64x128xbf16>
    %c1_118 = arith.constant 1 : index
    %c4_119 = arith.constant 4 : index
    %c0_120 = arith.constant 0 : index
    %c0_121 = arith.constant 0 : index
    %79 = vector.load %arg3[%c1_118, %c4_119, %c0_120, %c0_121] : memref<2x9x64x128xbf16, #tpu.memory_space<vmem>>, vector<1x1x64x128xbf16>
    %80 = vector.shape_cast %79 : vector<1x1x64x128xbf16> to vector<64x128xbf16>
    %c1_122 = arith.constant 1 : index
    %c5_123 = arith.constant 5 : index
    %c0_124 = arith.constant 0 : index
    %c0_125 = arith.constant 0 : index
    %81 = vector.load %arg3[%c1_122, %c5_123, %c0_124, %c0_125] : memref<2x9x64x128xbf16, #tpu.memory_space<vmem>>, vector<1x1x64x128xbf16>
    %82 = vector.shape_cast %81 : vector<1x1x64x128xbf16> to vector<64x128xbf16>
    %c1_126 = arith.constant 1 : index
    %c6_127 = arith.constant 6 : index
    %c0_128 = arith.constant 0 : index
    %c0_129 = arith.constant 0 : index
    %83 = vector.load %arg3[%c1_126, %c6_127, %c0_128, %c0_129] : memref<2x9x64x128xbf16, #tpu.memory_space<vmem>>, vector<1x1x64x128xbf16>
    %84 = vector.shape_cast %83 : vector<1x1x64x128xbf16> to vector<64x128xbf16>
    %c1_130 = arith.constant 1 : index
    %c7_131 = arith.constant 7 : index
    %c0_132 = arith.constant 0 : index
    %c0_133 = arith.constant 0 : index
    %85 = vector.load %arg3[%c1_130, %c7_131, %c0_132, %c0_133] : memref<2x9x64x128xbf16, #tpu.memory_space<vmem>>, vector<1x1x64x128xbf16>
    %86 = vector.shape_cast %85 : vector<1x1x64x128xbf16> to vector<64x128xbf16>
    %c1_134 = arith.constant 1 : index
    %c8_135 = arith.constant 8 : index
    %c0_136 = arith.constant 0 : index
    %c0_137 = arith.constant 0 : index
    %87 = vector.load %arg3[%c1_134, %c8_135, %c0_136, %c0_137] : memref<2x9x64x128xbf16, #tpu.memory_space<vmem>>, vector<1x1x64x128xbf16>
    %88 = vector.shape_cast %87 : vector<1x1x64x128xbf16> to vector<64x128xbf16>
    %cst_138 = arith.constant dense<0.000000e+00> : vector<24x128xf32>
    %89 = tpu.matmul %38, %54, %cst_138 {dimension_numbers = #tpu.dot_dimension_numbers<[1], [0], [0], [1], [0, 0, 1, 1], [], []>} : vector<24x64xbf16>, vector<64x128xbf16>, vector<24x128xf32> -> vector<24x128xf32>
    %cst_139 = arith.constant dense<0.000000e+00> : vector<24x128xf32>
    %90 = tpu.matmul %42, %56, %cst_139 {dimension_numbers = #tpu.dot_dimension_numbers<[1], [0], [0], [1], [0, 0, 1, 1], [], []>} : vector<24x64xbf16>, vector<64x128xbf16>, vector<24x128xf32> -> vector<24x128xf32>
    %91 = arith.addf %89, %90 : vector<24x128xf32>
    %cst_140 = arith.constant dense<0.000000e+00> : vector<24x128xf32>
    %92 = tpu.matmul %38, %58, %cst_140 {dimension_numbers = #tpu.dot_dimension_numbers<[1], [0], [0], [1], [0, 0, 1, 1], [], []>} : vector<24x64xbf16>, vector<64x128xbf16>, vector<24x128xf32> -> vector<24x128xf32>
    %93 = arith.addf %91, %92 : vector<24x128xf32>
    %cst_141 = arith.constant dense<0.000000e+00> : vector<24x128xf32>
    %94 = tpu.matmul %46, %60, %cst_141 {dimension_numbers = #tpu.dot_dimension_numbers<[1], [0], [0], [1], [0, 0, 1, 1], [], []>} : vector<24x64xbf16>, vector<64x128xbf16>, vector<24x128xf32> -> vector<24x128xf32>
    %95 = arith.addf %93, %94 : vector<24x128xf32>
    %cst_142 = arith.constant dense<0.000000e+00> : vector<24x128xf32>
    %96 = tpu.matmul %50, %62, %cst_142 {dimension_numbers = #tpu.dot_dimension_numbers<[1], [0], [0], [1], [0, 0, 1, 1], [], []>} : vector<24x64xbf16>, vector<64x128xbf16>, vector<24x128xf32> -> vector<24x128xf32>
    %97 = arith.addf %95, %96 : vector<24x128xf32>
    %cst_143 = arith.constant dense<0.000000e+00> : vector<24x128xf32>
    %98 = tpu.matmul %46, %64, %cst_143 {dimension_numbers = #tpu.dot_dimension_numbers<[1], [0], [0], [1], [0, 0, 1, 1], [], []>} : vector<24x64xbf16>, vector<64x128xbf16>, vector<24x128xf32> -> vector<24x128xf32>
    %99 = arith.addf %97, %98 : vector<24x128xf32>
    %cst_144 = arith.constant dense<0.000000e+00> : vector<24x128xf32>
    %100 = tpu.matmul %40, %66, %cst_144 {dimension_numbers = #tpu.dot_dimension_numbers<[1], [0], [0], [1], [0, 0, 1, 1], [], []>} : vector<24x64xbf16>, vector<64x128xbf16>, vector<24x128xf32> -> vector<24x128xf32>
    %101 = arith.addf %99, %100 : vector<24x128xf32>
    %cst_145 = arith.constant dense<0.000000e+00> : vector<24x128xf32>
    %102 = tpu.matmul %44, %68, %cst_145 {dimension_numbers = #tpu.dot_dimension_numbers<[1], [0], [0], [1], [0, 0, 1, 1], [], []>} : vector<24x64xbf16>, vector<64x128xbf16>, vector<24x128xf32> -> vector<24x128xf32>
    %103 = arith.addf %101, %102 : vector<24x128xf32>
    %cst_146 = arith.constant dense<0.000000e+00> : vector<24x128xf32>
    %104 = tpu.matmul %40, %70, %cst_146 {dimension_numbers = #tpu.dot_dimension_numbers<[1], [0], [0], [1], [0, 0, 1, 1], [], []>} : vector<24x64xbf16>, vector<64x128xbf16>, vector<24x128xf32> -> vector<24x128xf32>
    %105 = arith.addf %103, %104 : vector<24x128xf32>
    %cst_147 = arith.constant dense<0.000000e+00> : vector<24x128xf32>
    %106 = tpu.matmul %42, %72, %cst_147 {dimension_numbers = #tpu.dot_dimension_numbers<[1], [0], [0], [1], [0, 0, 1, 1], [], []>} : vector<24x64xbf16>, vector<64x128xbf16>, vector<24x128xf32> -> vector<24x128xf32>
    %cst_148 = arith.constant dense<0.000000e+00> : vector<24x128xf32>
    %107 = tpu.matmul %38, %74, %cst_148 {dimension_numbers = #tpu.dot_dimension_numbers<[1], [0], [0], [1], [0, 0, 1, 1], [], []>} : vector<24x64xbf16>, vector<64x128xbf16>, vector<24x128xf32> -> vector<24x128xf32>
    %108 = arith.addf %106, %107 : vector<24x128xf32>
    %cst_149 = arith.constant dense<0.000000e+00> : vector<24x128xf32>
    %109 = tpu.matmul %42, %76, %cst_149 {dimension_numbers = #tpu.dot_dimension_numbers<[1], [0], [0], [1], [0, 0, 1, 1], [], []>} : vector<24x64xbf16>, vector<64x128xbf16>, vector<24x128xf32> -> vector<24x128xf32>
    %110 = arith.addf %108, %109 : vector<24x128xf32>
    %cst_150 = arith.constant dense<0.000000e+00> : vector<24x128xf32>
    %111 = tpu.matmul %50, %78, %cst_150 {dimension_numbers = #tpu.dot_dimension_numbers<[1], [0], [0], [1], [0, 0, 1, 1], [], []>} : vector<24x64xbf16>, vector<64x128xbf16>, vector<24x128xf32> -> vector<24x128xf32>
    %112 = arith.addf %110, %111 : vector<24x128xf32>
    %cst_151 = arith.constant dense<0.000000e+00> : vector<24x128xf32>
    %113 = tpu.matmul %46, %80, %cst_151 {dimension_numbers = #tpu.dot_dimension_numbers<[1], [0], [0], [1], [0, 0, 1, 1], [], []>} : vector<24x64xbf16>, vector<64x128xbf16>, vector<24x128xf32> -> vector<24x128xf32>
    %114 = arith.addf %112, %113 : vector<24x128xf32>
    %cst_152 = arith.constant dense<0.000000e+00> : vector<24x128xf32>
    %115 = tpu.matmul %50, %82, %cst_152 {dimension_numbers = #tpu.dot_dimension_numbers<[1], [0], [0], [1], [0, 0, 1, 1], [], []>} : vector<24x64xbf16>, vector<64x128xbf16>, vector<24x128xf32> -> vector<24x128xf32>
    %116 = arith.addf %114, %115 : vector<24x128xf32>
    %cst_153 = arith.constant dense<0.000000e+00> : vector<24x128xf32>
    %117 = tpu.matmul %44, %84, %cst_153 {dimension_numbers = #tpu.dot_dimension_numbers<[1], [0], [0], [1], [0, 0, 1, 1], [], []>} : vector<24x64xbf16>, vector<64x128xbf16>, vector<24x128xf32> -> vector<24x128xf32>
    %118 = arith.addf %116, %117 : vector<24x128xf32>
    %cst_154 = arith.constant dense<0.000000e+00> : vector<24x128xf32>
    %119 = tpu.matmul %40, %86, %cst_154 {dimension_numbers = #tpu.dot_dimension_numbers<[1], [0], [0], [1], [0, 0, 1, 1], [], []>} : vector<24x64xbf16>, vector<64x128xbf16>, vector<24x128xf32> -> vector<24x128xf32>
    %120 = arith.addf %118, %119 : vector<24x128xf32>
    %cst_155 = arith.constant dense<0.000000e+00> : vector<24x128xf32>
    %121 = tpu.matmul %44, %88, %cst_155 {dimension_numbers = #tpu.dot_dimension_numbers<[1], [0], [0], [1], [0, 0, 1, 1], [], []>} : vector<24x64xbf16>, vector<64x128xbf16>, vector<24x128xf32> -> vector<24x128xf32>
    %122 = arith.addf %120, %121 : vector<24x128xf32>
    %cst_156 = arith.constant dense<0.000000e+00> : vector<24x128xf32>
    %123 = tpu.matmul %46, %54, %cst_156 {dimension_numbers = #tpu.dot_dimension_numbers<[1], [0], [0], [1], [0, 0, 1, 1], [], []>} : vector<24x64xbf16>, vector<64x128xbf16>, vector<24x128xf32> -> vector<24x128xf32>
    %cst_157 = arith.constant dense<0.000000e+00> : vector<24x128xf32>
    %124 = tpu.matmul %50, %56, %cst_157 {dimension_numbers = #tpu.dot_dimension_numbers<[1], [0], [0], [1], [0, 0, 1, 1], [], []>} : vector<24x64xbf16>, vector<64x128xbf16>, vector<24x128xf32> -> vector<24x128xf32>
    %125 = arith.addf %123, %124 : vector<24x128xf32>
    %cst_158 = arith.constant dense<0.000000e+00> : vector<24x128xf32>
    %126 = tpu.matmul %46, %58, %cst_158 {dimension_numbers = #tpu.dot_dimension_numbers<[1], [0], [0], [1], [0, 0, 1, 1], [], []>} : vector<24x64xbf16>, vector<64x128xbf16>, vector<24x128xf32> -> vector<24x128xf32>
    %127 = arith.addf %125, %126 : vector<24x128xf32>
    %cst_159 = arith.constant dense<0.000000e+00> : vector<24x128xf32>
    %128 = tpu.matmul %40, %60, %cst_159 {dimension_numbers = #tpu.dot_dimension_numbers<[1], [0], [0], [1], [0, 0, 1, 1], [], []>} : vector<24x64xbf16>, vector<64x128xbf16>, vector<24x128xf32> -> vector<24x128xf32>
    %129 = arith.addf %127, %128 : vector<24x128xf32>
    %cst_160 = arith.constant dense<0.000000e+00> : vector<24x128xf32>
    %130 = tpu.matmul %44, %62, %cst_160 {dimension_numbers = #tpu.dot_dimension_numbers<[1], [0], [0], [1], [0, 0, 1, 1], [], []>} : vector<24x64xbf16>, vector<64x128xbf16>, vector<24x128xf32> -> vector<24x128xf32>
    %131 = arith.addf %129, %130 : vector<24x128xf32>
    %cst_161 = arith.constant dense<0.000000e+00> : vector<24x128xf32>
    %132 = tpu.matmul %40, %64, %cst_161 {dimension_numbers = #tpu.dot_dimension_numbers<[1], [0], [0], [1], [0, 0, 1, 1], [], []>} : vector<24x64xbf16>, vector<64x128xbf16>, vector<24x128xf32> -> vector<24x128xf32>
    %133 = arith.addf %131, %132 : vector<24x128xf32>
    %cst_162 = arith.constant dense<0.000000e+00> : vector<24x128xf32>
    %134 = tpu.matmul %48, %66, %cst_162 {dimension_numbers = #tpu.dot_dimension_numbers<[1], [0], [0], [1], [0, 0, 1, 1], [], []>} : vector<24x64xbf16>, vector<64x128xbf16>, vector<24x128xf32> -> vector<24x128xf32>
    %135 = arith.addf %133, %134 : vector<24x128xf32>
    %cst_163 = arith.constant dense<0.000000e+00> : vector<24x128xf32>
    %136 = tpu.matmul %52, %68, %cst_163 {dimension_numbers = #tpu.dot_dimension_numbers<[1], [0], [0], [1], [0, 0, 1, 1], [], []>} : vector<24x64xbf16>, vector<64x128xbf16>, vector<24x128xf32> -> vector<24x128xf32>
    %137 = arith.addf %135, %136 : vector<24x128xf32>
    %cst_164 = arith.constant dense<0.000000e+00> : vector<24x128xf32>
    %138 = tpu.matmul %48, %70, %cst_164 {dimension_numbers = #tpu.dot_dimension_numbers<[1], [0], [0], [1], [0, 0, 1, 1], [], []>} : vector<24x64xbf16>, vector<64x128xbf16>, vector<24x128xf32> -> vector<24x128xf32>
    %139 = arith.addf %137, %138 : vector<24x128xf32>
    %cst_165 = arith.constant dense<0.000000e+00> : vector<24x128xf32>
    %140 = tpu.matmul %50, %72, %cst_165 {dimension_numbers = #tpu.dot_dimension_numbers<[1], [0], [0], [1], [0, 0, 1, 1], [], []>} : vector<24x64xbf16>, vector<64x128xbf16>, vector<24x128xf32> -> vector<24x128xf32>
    %cst_166 = arith.constant dense<0.000000e+00> : vector<24x128xf32>
    %141 = tpu.matmul %46, %74, %cst_166 {dimension_numbers = #tpu.dot_dimension_numbers<[1], [0], [0], [1], [0, 0, 1, 1], [], []>} : vector<24x64xbf16>, vector<64x128xbf16>, vector<24x128xf32> -> vector<24x128xf32>
    %142 = arith.addf %140, %141 : vector<24x128xf32>
    %cst_167 = arith.constant dense<0.000000e+00> : vector<24x128xf32>
    %143 = tpu.matmul %50, %76, %cst_167 {dimension_numbers = #tpu.dot_dimension_numbers<[1], [0], [0], [1], [0, 0, 1, 1], [], []>} : vector<24x64xbf16>, vector<64x128xbf16>, vector<24x128xf32> -> vector<24x128xf32>
    %144 = arith.addf %142, %143 : vector<24x128xf32>
    %cst_168 = arith.constant dense<0.000000e+00> : vector<24x128xf32>
    %145 = tpu.matmul %44, %78, %cst_168 {dimension_numbers = #tpu.dot_dimension_numbers<[1], [0], [0], [1], [0, 0, 1, 1], [], []>} : vector<24x64xbf16>, vector<64x128xbf16>, vector<24x128xf32> -> vector<24x128xf32>
    %146 = arith.addf %144, %145 : vector<24x128xf32>
    %cst_169 = arith.constant dense<0.000000e+00> : vector<24x128xf32>
    %147 = tpu.matmul %40, %80, %cst_169 {dimension_numbers = #tpu.dot_dimension_numbers<[1], [0], [0], [1], [0, 0, 1, 1], [], []>} : vector<24x64xbf16>, vector<64x128xbf16>, vector<24x128xf32> -> vector<24x128xf32>
    %148 = arith.addf %146, %147 : vector<24x128xf32>
    %cst_170 = arith.constant dense<0.000000e+00> : vector<24x128xf32>
    %149 = tpu.matmul %44, %82, %cst_170 {dimension_numbers = #tpu.dot_dimension_numbers<[1], [0], [0], [1], [0, 0, 1, 1], [], []>} : vector<24x64xbf16>, vector<64x128xbf16>, vector<24x128xf32> -> vector<24x128xf32>
    %150 = arith.addf %148, %149 : vector<24x128xf32>
    %cst_171 = arith.constant dense<0.000000e+00> : vector<24x128xf32>
    %151 = tpu.matmul %52, %84, %cst_171 {dimension_numbers = #tpu.dot_dimension_numbers<[1], [0], [0], [1], [0, 0, 1, 1], [], []>} : vector<24x64xbf16>, vector<64x128xbf16>, vector<24x128xf32> -> vector<24x128xf32>
    %152 = arith.addf %150, %151 : vector<24x128xf32>
    %cst_172 = arith.constant dense<0.000000e+00> : vector<24x128xf32>
    %153 = tpu.matmul %48, %86, %cst_172 {dimension_numbers = #tpu.dot_dimension_numbers<[1], [0], [0], [1], [0, 0, 1, 1], [], []>} : vector<24x64xbf16>, vector<64x128xbf16>, vector<24x128xf32> -> vector<24x128xf32>
    %154 = arith.addf %152, %153 : vector<24x128xf32>
    %cst_173 = arith.constant dense<0.000000e+00> : vector<24x128xf32>
    %155 = tpu.matmul %52, %88, %cst_173 {dimension_numbers = #tpu.dot_dimension_numbers<[1], [0], [0], [1], [0, 0, 1, 1], [], []>} : vector<24x64xbf16>, vector<64x128xbf16>, vector<24x128xf32> -> vector<24x128xf32>
    %156 = arith.addf %154, %155 : vector<24x128xf32>
    %157 = arith.maximumf %105, %122 : vector<24x128xf32>
    %158 = arith.maximumf %139, %156 : vector<24x128xf32>
    %159 = arith.maximumf %157, %158 : vector<24x128xf32>
    %cst_174 = arith.constant 0.000000e+00 : f32
    %160 = vector.broadcast %cst_174 : f32 to vector<24x128xf32>
    %161 = arith.maximumf %159, %160 : vector<24x128xf32>
    %162 = arith.truncf %161 : vector<24x128xf32> to vector<24x128xbf16>
    %c0_175 = arith.constant 0 : index
    %c0_176 = arith.constant 0 : index
    %c0_177 = arith.constant 0 : index
    %163 = vector.load %arg4[%c0_175, %c0_176, %c0_177] : memref<1x24x128xbf16, #tpu.memory_space<vmem>>, vector<1x24x128xbf16>
    %164 = vector.shape_cast %163 : vector<1x24x128xbf16> to vector<24x128xbf16>
    %165 = vector.shape_cast %162 : vector<24x128xbf16> to vector<1x24x128xbf16>
    tpu.vector_store %arg4[%c0_175, %c0_176, %c0_177], %165 {strides = array<i32>} : memref<1x24x128xbf16, #tpu.memory_space<vmem>>, vector<1x24x128xbf16>,
    return
  }
  func.func @transform_0(%arg0: i32) -> (i32, i32, i32, i32) {
    %c0_i32 = arith.constant 0 : i32
    %c0_i32_0 = arith.constant 0 : i32
    %c0_i32_1 = arith.constant 0 : i32
    %c0_i32_2 = arith.constant 0 : i32
    return %arg0, %c0_i32, %c0_i32_0, %c0_i32_1 : i32, i32, i32, i32
  }
  func.func @transform_1(%arg0: i32) -> (i32, i32) {
    %c0_i32 = arith.constant 0 : i32
    %c0_i32_0 = arith.constant 0 : i32
    %c0_i32_1 = arith.constant 0 : i32
    return %c0_i32, %c0_i32_0 : i32, i32
  }
  func.func @transform_2(%arg0: i32) -> (i32, i32, i32, i32) {
    %c0_i32 = arith.constant 0 : i32
    %c0_i32_0 = arith.constant 0 : i32
    %c0_i32_1 = arith.constant 0 : i32
    %c0_i32_2 = arith.constant 0 : i32
    %c0_i32_3 = arith.constant 0 : i32
    return %c0_i32, %c0_i32_0, %c0_i32_1, %c0_i32_2 : i32, i32, i32, i32
  }
  func.func @transform_3(%arg0: i32) -> (i32, i32, i32) {
    %c0_i32 = arith.constant 0 : i32
    %c0_i32_0 = arith.constant 0 : i32
    %c0_i32_1 = arith.constant 0 : i32
    return %arg0, %c0_i32, %c0_i32_0 : i32, i32, i32
  }
}

module attributes {stable_mosaic.version = 11 : i64} {
  func.func @_protodist_kernel(%arg0: memref<8x2x512xf32, #tpu.memory_space<vmem>>, %arg1: memref<8x512xf32, #tpu.memory_space<vmem>>, %arg2: memref<8x8xf32, #tpu.memory_space<vmem>>) attributes {dimension_semantics = [], scalar_prefetch = 0 : i64, scratch_operands = 0 : i64, tpu.core_type = #tpu.core_type<tc>} {
    %c0 = arith.constant 0 : index
    %c0_0 = arith.constant 0 : index
    %c0_1 = arith.constant 0 : index
    %0 = vector.load %arg0[%c0, %c0_0, %c0_1] : memref<8x2x512xf32, #tpu.memory_space<vmem>>, vector<8x2x512xf32>
    %cst = arith.constant dense<0.000000e+00> : vector<8x512xf32>
    %1 = vector.multi_reduction <add>, %0, %cst [1] : vector<8x2x512xf32> to vector<8x512xf32>
    %cst_2 = arith.constant 2.000000e+00 : f32
    %2 = vector.broadcast %cst_2 : f32 to vector<8x512xf32>
    %3 = arith.divf %1, %2 : vector<8x512xf32>
    %c0_3 = arith.constant 0 : index
    %c0_4 = arith.constant 0 : index
    %4 = vector.load %arg1[%c0_3, %c0_4] : memref<8x512xf32, #tpu.memory_space<vmem>>, vector<8x512xf32>
    %5 = vector.shape_cast %4 : vector<8x512xf32> to vector<8x1x512xf32>
    %6 = vector.shape_cast %3 : vector<8x512xf32> to vector<1x8x512xf32>
    %7 = vector.broadcast %5 : vector<8x1x512xf32> to vector<8x8x512xf32>
    %8 = vector.broadcast %6 : vector<1x8x512xf32> to vector<8x8x512xf32>
    %9 = arith.subf %7, %8 : vector<8x8x512xf32>
    %10 = arith.mulf %9, %9 : vector<8x8x512xf32>
    %cst_5 = arith.constant dense<0.000000e+00> : vector<8x8xf32>
    %11 = vector.multi_reduction <add>, %10, %cst_5 [2] : vector<8x8x512xf32> to vector<8x8xf32>
    %cst_6 = arith.constant 0.000000e+00 : f32
    %12 = vector.broadcast %cst_6 : f32 to vector<8x8xf32>
    %13 = arith.subf %12, %11 : vector<8x8xf32>
    %c0_7 = arith.constant 0 : index
    %c0_8 = arith.constant 0 : index
    %14 = vector.load %arg2[%c0_7, %c0_8] : memref<8x8xf32, #tpu.memory_space<vmem>>, vector<8x8xf32>
    tpu.vector_store %arg2[%c0_7, %c0_8], %13 {strides = array<i32>} : memref<8x8xf32, #tpu.memory_space<vmem>>, vector<8x8xf32>,
    return
  }
}

</mosaic_0001>

<bundles_post_ra>
// kernel: protonet_forward.3
= control target key start
LH: loop header
LB: loop body
LE: loop exit
PB: predicated region body
PF: predicated region fallthrough
CT: control target
= control target key end

     0   :  { %v1339_v0 = vlaneseq  ;;  %v944_v4 = vmov 1983009808   ;;  %v945_v6 = vmov 1966171168   ;;  %vm195_vm0 = vcmask 1041408   ;;  %s1336_s0 = inlined_call_operand.vmem [shape: f32[8,2,512], index: 0, kind: input, shape index: {}]   ;;  %s1337_s1 = inlined_call_operand.vmem [shape: f32[8,512], index: 1, kind: input, shape index: {}]   ;;  %s1338_s2 = inlined_call_operand.vmem [shape: f32[8,8], index: 2, kind: output, shape index: {}]  }
   0x1   :  { %v11_v1 = vld [vmem:[%s1336_s0] sm:$0xff]  ;;  %v12_v2 = vld [vmem:[%s1336_s0 + $0x8] sm:$0xff]  ;;  %v13_v3 = vld [vmem:[%s1336_s0 + $0x10] sm:$0xff]  ;;  %v29_v5 = vunpack.c.l.s4 %v944_v4  ;;  %v466_v7 = vunpack.c.l.s4 %v945_v6  ;;  %vm721_vm1 = vcmask 1041409   ;;  %vm723_vm2 = vcmask 1042434  }
   0x2   :  { %v14_v8 = vld [vmem:[%s1336_s0 + $0x18] sm:$0xff]  ;;  %v15_v9 = vld [vmem:[%s1336_s0 + $0x20] sm:$0xff]  ;;  %v16_v10 = vld [vmem:[%s1336_s0 + $0x28] sm:$0xff]  ;;  %v980_v11 = vshrl.u32 %v1339_v0, 7  ;;  %v27_v14 = vcombine.high %v11_v1, %v11_v1  ;;  %v44_v16 = vcombine.high %v12_v2, %v12_v2  ;;  %v61_v17 = vcombine.high %v13_v3, %v13_v3 }
   0x3   :  { %v17_v12 = vld [vmem:[%s1336_s0 + $0x30] sm:$0xff]  ;;  %v18_v13 = vld [vmem:[%s1336_s0 + $0x38] sm:$0xff]  ;;  %v30_v15 = vunpack.c.0.s8 %v29_v5  ;;  %v78_v18 = vcombine.high %v14_v8, %v14_v8  ;;  %v95_v19 = vcombine.high %v15_v9, %v15_v9  ;;  %v112_v20 = vcombine.high %v16_v10, %v16_v10 }
   0x4   :  { %1342 = vst [vmem:[#allocation2_spill] sm:$0xff] %v980_v11  ;;  %v467_v21 = vunpack.c.0.s8 %v466_v7  ;;  %v129_v23 = vcombine.high %v17_v12, %v17_v12  ;;  %v146_v24 = vcombine.high %v18_v13, %v18_v13  ;;  %v990_v25 = vsub.s32 0, %v980_v11 }
   0x5   :  { %v33_v22 = vsub.s32 %v30_v15, %v980_v11  ;;  %v996_v27 = vsub.s32 1, %v980_v11  ;;  %v999_v28 = vsub.s32 2, %v980_v11  ;;  %v1002_v29 = vsub.s32 3, %v980_v11 }
   0x6   :  { %v993_v26 = vsub.s32 %v467_v21, %v980_v11  ;;  %vm725_vm3 = vcmask 1043459   ;;  %vm727_vm4 = vcmask 1044484   ;;  %vm729_vm5 = vcmask 1045509  }
   0x7   :  { %1343 = vst [vmem:[#allocation3_spill] sm:$0xff] %v1002_v29  ;;  %v34_v30 = vrot.slane %v11_v1, %v33_v22  ;;  %v41_v31 = vrot.slane %v27_v14, %v33_v22  ;;  %v51_v32 = vrot.slane %v12_v2, %v33_v22  ;;  %v58_v33 = vrot.slane %v44_v16, %v33_v22 }
   0x8   :  { %v1004_v34 = vrot.slane %v13_v3, %v33_v22  ;;  %v1006_v35 = vrot.slane %v61_v17, %v33_v22  ;;  %v1008_v36 = vrot.slane %v14_v8, %v33_v22  ;;  %v1010_v37 = vrot.slane %v78_v18, %v33_v22 }
   0x9   :  { %v42_v38 = vcombine.high %v34_v30, %v34_v30  ;;  %v43_v39 = vcombine.high %v41_v31, %v41_v31  ;;  %v59_v40 = vcombine.high %v51_v32, %v51_v32  ;;  %v60_v41 = vcombine.high %v58_v33, %v58_v33 }
   0xa   :  { %v76_v42 = vcombine.high %v1004_v34, %v1004_v34  ;;  %v77_v43 = vcombine.high %v1006_v35, %v1006_v35  ;;  %v93_v44 = vcombine.high %v1008_v36, %v1008_v36  ;;  %v94_v45 = vcombine.high %v1010_v37, %v1010_v37 }
   0xb   :  { %v1020_v46 = vrot.slane %v15_v9, %v33_v22  ;;  %v1022_v47 = vrot.slane %v95_v19, %v33_v22  ;;  %v1024_v48 = vrot.slane %v16_v10, %v33_v22  ;;  %v1026_v49 = vrot.slane %v112_v20, %v33_v22 }
   0xc   :  { %v1028_v50 = vrot.slane %v17_v12, %v33_v22  ;;  %v1030_v51 = vrot.slane %v129_v23, %v33_v22  ;;  %v1032_v52 = vrot.slane %v18_v13, %v33_v22  ;;  %v1034_v53 = vrot.slane %v146_v24, %v33_v22 }
   0xd   :  { %v110_v54 = vcombine.high %v1020_v46, %v1020_v46  ;;  %v111_v55 = vcombine.high %v1022_v47, %v1022_v47  ;;  %v127_v56 = vcombine.high %v1024_v48, %v1024_v48  ;;  %v128_v57 = vcombine.high %v1026_v49, %v1026_v49 }
   0xe   :  { %v144_v58 = vcombine.high %v1028_v50, %v1028_v50  ;;  %v145_v59 = vcombine.high %v1030_v51, %v1030_v51  ;;  %v196_v62 = vsel %vm195_vm0, %v34_v30, 0.0  ;;  %v203_v63 = vsel %vm195_vm0, %v42_v38, 0.0 }
   0xf   :  { %v210_v1 = vsel %vm195_vm0, %v41_v31, 0.0  ;;  %v217_v2 = vsel %vm195_vm0, %v43_v39, 0.0  ;;  %v197_v3 = vrot.slane %v196_v62, 4  ;;  %v204_v4 = vrot.slane %v203_v63, 4 }
  0x10   :  { %v211_v5 = vrot.slane %v210_v1, 4  ;;  %v218_v6 = vrot.slane %v217_v2, 4  ;;  %v224_v7 = vsel %vm195_vm0, %v51_v32, 0.0  ;;  %v231_v8 = vsel %vm195_vm0, %v59_v40, 0.0 }
  0x11   :  { %v238_v9 = vsel %vm195_vm0, %v58_v33, 0.0  ;;  %v245_v10 = vsel %vm195_vm0, %v60_v41, 0.0  ;;  %v198_v12 = vadd.f32 %v197_v3, %v196_v62  ;;  %v205_v13 = vadd.f32 %v204_v4, %v203_v63 }
  0x12   :  { %v212_v14 = vadd.f32 %v211_v5, %v210_v1  ;;  %v219_v15 = vadd.f32 %v218_v6, %v217_v2  ;;  %v225_v16 = vrot.slane %v224_v7, 4  ;;  %v232_v17 = vrot.slane %v231_v8, 4 }
  0x13   :  { %v239_v18 = vrot.slane %v238_v9, 4  ;;  %v246_v19 = vrot.slane %v245_v10, 4  ;;  %v199_v20 = vrot.slane %v198_v12, 2  ;;  %v206_v21 = vrot.slane %v205_v13, 2 }
  0x14   :  { %v213_v22 = vrot.slane %v212_v14, 2  ;;  %v220_v23 = vrot.slane %v219_v15, 2  ;;  %v226_v24 = vadd.f32 %v225_v16, %v224_v7  ;;  %v233_v30 = vadd.f32 %v232_v17, %v231_v8 }
  0x15   :  { %v240_v31 = vadd.f32 %v239_v18, %v238_v9  ;;  %v247_v32 = vadd.f32 %v246_v19, %v245_v10  ;;  %v200_v38 = vadd.f32 %v199_v20, %v198_v12  ;;  %v207_v33 = vadd.f32 %v206_v21, %v205_v13 }
  0x16   :  { %v214_v39 = vadd.f32 %v213_v22, %v212_v14  ;;  %v221_v40 = vadd.f32 %v220_v23, %v219_v15  ;;  %v227_v41 = vrot.slane %v226_v24, 2  ;;  %v234_v62 = vrot.slane %v233_v30, 2 }
  0x17   :  { %v241_v63 = vrot.slane %v240_v31, 2  ;;  %v248_v1 = vrot.slane %v247_v32, 2  ;;  %v201_v2 = vrot.slane %v200_v38, 1  ;;  %v208_v3 = vrot.slane %v207_v33, 1 }
  0x18   :  { %v215_v4 = vrot.slane %v214_v39, 1  ;;  %v222_v5 = vrot.slane %v221_v40, 1  ;;  %v228_v6 = vadd.f32 %v227_v41, %v226_v24  ;;  %v235_v0 = vadd.f32 %v234_v62, %v233_v30 }
  0x19   :  { %v242_v61 = vadd.f32 %v241_v63, %v240_v31  ;;  %v249_v60 = vadd.f32 %v248_v1, %v247_v32  ;;  %v1060_v7 = vadd.f32 %v201_v2, %v200_v38  ;;  %v1062_v8 = vadd.f32 %v208_v3, %v207_v33 }
  0x1a   :  { %v1064_v9 = vadd.f32 %v215_v4, %v214_v39  ;;  %v1066_v10 = vadd.f32 %v222_v5, %v221_v40  ;;  %v229_v12 = vrot.slane %v228_v6, 1  ;;  %v236_v13 = vrot.slane %v235_v0, 1 }
  0x1b   :  { %v243_v14 = vrot.slane %v242_v61, 1  ;;  %v250_v15 = vrot.slane %v249_v60, 1  ;;  %v252_v16 = vsel %vm195_vm0, %v1004_v34, 0.0  ;;  %v259_v17 = vsel %vm195_vm0, %v76_v42, 0.0 }
  0x1c   :  { %v266_v18 = vsel %vm195_vm0, %v1006_v35, 0.0  ;;  %v273_v19 = vsel %vm195_vm0, %v77_v43, 0.0  ;;  %v1080_v20 = vadd.f32 %v229_v12, %v228_v6  ;;  %v1082_v21 = vadd.f32 %v236_v13, %v235_v0 }
  0x1d   :  { %v1084_v22 = vadd.f32 %v243_v14, %v242_v61  ;;  %v1086_v23 = vadd.f32 %v250_v15, %v249_v60  ;;  %v253_v24 = vrot.slane %v252_v16, 4  ;;  %v260_v34 = vrot.slane %v259_v17, 4 }
  0x1e   :  { %v267_v30 = vrot.slane %v266_v18, 4  ;;  %v274_v42 = vrot.slane %v273_v19, 4  ;;  %v280_v31 = vsel %vm195_vm0, %v1008_v36, 0.0  ;;  %v287_v35 = vsel %vm195_vm0, %v93_v44, 0.0 }
  0x1f   :  { %v294_v0 = vsel %vm195_vm0, %v1010_v37, 0.0  ;;  %v301_v43 = vsel %vm195_vm0, %v94_v45, 0.0  ;;  %v254_v60 = vadd.f32 %v253_v24, %v252_v16  ;;  %v261_v61 = vadd.f32 %v260_v34, %v259_v17 }
  0x20   :  { %v268_v32 = vadd.f32 %v267_v30, %v266_v18  ;;  %v275_v38 = vadd.f32 %v274_v42, %v273_v19  ;;  %v281_v33 = vrot.slane %v280_v31, 4  ;;  %v288_v39 = vrot.slane %v287_v35, 4 }
  0x21   :  { %v295_v40 = vrot.slane %v294_v0, 4  ;;  %v302_v41 = vrot.slane %v301_v43, 4  ;;  %v255_v62 = vrot.slane %v254_v60, 2  ;;  %v262_v36 = vrot.slane %v261_v61, 2 }
  0x22   :  { %v269_v63 = vrot.slane %v268_v32, 2  ;;  %v276_v44 = vrot.slane %v275_v38, 2  ;;  %v282_v1 = vadd.f32 %v281_v33, %v280_v31  ;;  %v289_v2 = vadd.f32 %v288_v39, %v287_v35 }
  0x23   :  { %v296_v3 = vadd.f32 %v295_v40, %v294_v0  ;;  %v303_v4 = vadd.f32 %v302_v41, %v301_v43  ;;  %v256_v5 = vadd.f32 %v255_v62, %v254_v60  ;;  %v263_v37 = vadd.f32 %v262_v36, %v261_v61 }
  0x24   :  { %v270_v6 = vadd.f32 %v269_v63, %v268_v32  ;;  %v277_v45 = vadd.f32 %v276_v44, %v275_v38  ;;  %v283_v12 = vrot.slane %v282_v1, 2  ;;  %v290_v13 = vrot.slane %v289_v2, 2 }
  0x25   :  { %v297_v14 = vrot.slane %v296_v3, 2  ;;  %v304_v15 = vrot.slane %v303_v4, 2  ;;  %v257_v16 = vrot.slane %v256_v5, 1  ;;  %v264_v17 = vrot.slane %v263_v37, 1 }
  0x26   :  { %v271_v18 = vrot.slane %v270_v6, 1  ;;  %v278_v19 = vrot.slane %v277_v45, 1  ;;  %v284_v24 = vadd.f32 %v283_v12, %v282_v1  ;;  %v291_v34 = vadd.f32 %v290_v13, %v289_v2 }
  0x27   :  { %v298_v30 = vadd.f32 %v297_v14, %v296_v3  ;;  %v305_v42 = vadd.f32 %v304_v15, %v303_v4  ;;  %v1100_v31 = vadd.f32 %v257_v16, %v256_v5  ;;  %v1102_v35 = vadd.f32 %v264_v17, %v263_v37 }
  0x28   :  { %v1104_v0 = vadd.f32 %v271_v18, %v270_v6  ;;  %v1106_v43 = vadd.f32 %v278_v19, %v277_v45  ;;  %v285_v60 = vrot.slane %v284_v24, 1  ;;  %v292_v61 = vrot.slane %v291_v34, 1 }
  0x29   :  { %v299_v32 = vrot.slane %v298_v30, 1  ;;  %v306_v38 = vrot.slane %v305_v42, 1  ;;  %v308_v33 = vsel %vm195_vm0, %v1020_v46, 0.0  ;;  %v315_v39 = vsel %vm195_vm0, %v110_v54, 0.0 }
  0x2a   :  { %v322_v40 = vsel %vm195_vm0, %v1022_v47, 0.0  ;;  %v329_v41 = vsel %vm195_vm0, %v111_v55, 0.0  ;;  %v1120_v62 = vadd.f32 %v285_v60, %v284_v24  ;;  %v1122_v36 = vadd.f32 %v292_v61, %v291_v34 }
  0x2b   :  { %v1124_v63 = vadd.f32 %v299_v32, %v298_v30  ;;  %v1126_v44 = vadd.f32 %v306_v38, %v305_v42  ;;  %v309_v1 = vrot.slane %v308_v33, 4  ;;  %v316_v46 = vrot.slane %v315_v39, 4 }
  0x2c   :  { %v323_v2 = vrot.slane %v322_v40, 4  ;;  %v330_v54 = vrot.slane %v329_v41, 4  ;;  %v336_v3 = vsel %vm195_vm0, %v1024_v48, 0.0  ;;  %v343_v47 = vsel %vm195_vm0, %v127_v56, 0.0 }
  0x2d   :  { %v350_v55 = vsel %vm195_vm0, %v1026_v49, 0.0  ;;  %v357_v4 = vsel %vm195_vm0, %v128_v57, 0.0  ;;  %v310_v5 = vadd.f32 %v309_v1, %v308_v33  ;;  %v317_v37 = vadd.f32 %v316_v46, %v315_v39 }
  0x2e   :  { %v324_v6 = vadd.f32 %v323_v2, %v322_v40  ;;  %v331_v45 = vadd.f32 %v330_v54, %v329_v41  ;;  %v337_v12 = vrot.slane %v336_v3, 4  ;;  %v344_v13 = vrot.slane %v343_v47, 4 }
  0x2f   :  { %v351_v14 = vrot.slane %v350_v55, 4  ;;  %v358_v15 = vrot.slane %v357_v4, 4  ;;  %v311_v16 = vrot.slane %v310_v5, 2  ;;  %v318_v48 = vrot.slane %v317_v37, 2 }
  0x30   :  { %v325_v17 = vrot.slane %v324_v6, 2  ;;  %v332_v56 = vrot.slane %v331_v45, 2  ;;  %v338_v18 = vadd.f32 %v337_v12, %v336_v3  ;;  %v345_v19 = vadd.f32 %v344_v13, %v343_v47 }
  0x31   :  { %v352_v24 = vadd.f32 %v351_v14, %v350_v55  ;;  %v359_v34 = vadd.f32 %v358_v15, %v357_v4  ;;  %v312_v30 = vadd.f32 %v311_v16, %v310_v5  ;;  %v319_v49 = vadd.f32 %v318_v48, %v317_v37 }
  0x32   :  { %v326_v42 = vadd.f32 %v325_v17, %v324_v6  ;;  %v333_v57 = vadd.f32 %v332_v56, %v331_v45  ;;  %v339_v60 = vrot.slane %v338_v18, 2  ;;  %v346_v61 = vrot.slane %v345_v19, 2 }
  0x33   :  { %v353_v32 = vrot.slane %v352_v24, 2  ;;  %v360_v38 = vrot.slane %v359_v34, 2  ;;  %v313_v33 = vrot.slane %v312_v30, 1  ;;  %v320_v39 = vrot.slane %v319_v49, 1 }
  0x34   :  { %v327_v40 = vrot.slane %v326_v42, 1  ;;  %v334_v41 = vrot.slane %v333_v57, 1  ;;  %v340_v1 = vadd.f32 %v339_v60, %v338_v18  ;;  %v347_v46 = vadd.f32 %v346_v61, %v345_v19 }
  0x35   :  { %v354_v2 = vadd.f32 %v353_v32, %v352_v24  ;;  %v361_v54 = vadd.f32 %v360_v38, %v359_v34  ;;  %v1140_v3 = vadd.f32 %v313_v33, %v312_v30  ;;  %v1142_v47 = vadd.f32 %v320_v39, %v319_v49 }
  0x36   :  { %v1144_v55 = vadd.f32 %v327_v40, %v326_v42  ;;  %v1146_v4 = vadd.f32 %v334_v41, %v333_v57  ;;  %v341_v5 = vrot.slane %v340_v1, 1  ;;  %v348_v37 = vrot.slane %v347_v46, 1 }
  0x37   :  { %v355_v6 = vrot.slane %v354_v2, 1  ;;  %v362_v45 = vrot.slane %v361_v54, 1  ;;  %v364_v12 = vsel %vm195_vm0, %v1028_v50, 0.0  ;;  %v371_v13 = vsel %vm195_vm0, %v144_v58, 0.0 }
  0x38   :  { %v378_v14 = vsel %vm195_vm0, %v1030_v51, 0.0  ;;  %v385_v15 = vsel %vm195_vm0, %v145_v59, 0.0  ;;  %v1160_v16 = vadd.f32 %v341_v5, %v340_v1  ;;  %v1162_v48 = vadd.f32 %v348_v37, %v347_v46 }
  0x39   :  { %v1164_v17 = vadd.f32 %v355_v6, %v354_v2  ;;  %v1166_v56 = vadd.f32 %v362_v45, %v361_v54  ;;  %v365_v18 = vrot.slane %v364_v12, 4  ;;  %v372_v50 = vrot.slane %v371_v13, 4 }
  0x3a   :  { %v379_v19 = vrot.slane %v378_v14, 4  ;;  %v386_v58 = vrot.slane %v385_v15, 4  ;;  %v392_v24 = vsel %vm195_vm0, %v1032_v52, 0.0  ;;  %v1344_v51 = vcombine.high %v1032_v52, %v1032_v52 }
  0x3b   :  { %v406_v34 = vsel %vm195_vm0, %v1034_v53, 0.0  ;;  %v1345_v30 = vcombine.high %v1034_v53, %v1034_v53  ;;  %v366_v42 = vadd.f32 %v365_v18, %v364_v12  ;;  %v373_v57 = vadd.f32 %v372_v50, %v371_v13 }
  0x3c   :  { %v399_v59 = vsel %vm195_vm0, %v1344_v51, 0.0  ;;  %v380_v60 = vadd.f32 %v379_v19, %v378_v14  ;;  %v387_v61 = vadd.f32 %v386_v58, %v385_v15  ;;  %v393_v32 = vrot.slane %v392_v24, 4 }
  0x3d   :  { %v413_v49 = vsel %vm195_vm0, %v1345_v30, 0.0  ;;  %v400_v38 = vrot.slane %v399_v59, 4  ;;  %v407_v33 = vrot.slane %v406_v34, 4  ;;  %v367_v40 = vrot.slane %v366_v42, 2 }
  0x3e   :  { %v414_v39 = vrot.slane %v413_v49, 4  ;;  %v374_v52 = vrot.slane %v373_v57, 2  ;;  %v381_v41 = vrot.slane %v380_v60, 2  ;;  %v388_v1 = vrot.slane %v387_v61, 2 }
  0x3f   :  { %v394_v46 = vadd.f32 %v393_v32, %v392_v24  ;;  %v401_v2 = vadd.f32 %v400_v38, %v399_v59  ;;  %v408_v54 = vadd.f32 %v407_v33, %v406_v34  ;;  %v368_v37 = vadd.f32 %v367_v40, %v366_v42 }
  0x40   :  { %v415_v5 = vadd.f32 %v414_v39, %v413_v49  ;;  %v375_v53 = vadd.f32 %v374_v52, %v373_v57  ;;  %v382_v6 = vadd.f32 %v381_v41, %v380_v60  ;;  %v389_v45 = vadd.f32 %v388_v1, %v387_v61 }
  0x41   :  { %v395_v12 = vrot.slane %v394_v46, 2  ;;  %v402_v13 = vrot.slane %v401_v2, 2  ;;  %v409_v14 = vrot.slane %v408_v54, 2  ;;  %v369_v18 = vrot.slane %v368_v37, 1 }
  0x42   :  { %v416_v15 = vrot.slane %v415_v5, 2  ;;  %v376_v50 = vrot.slane %v375_v53, 1  ;;  %v383_v19 = vrot.slane %v382_v6, 1  ;;  %v390_v58 = vrot.slane %v389_v45, 1 }
  0x43   :  { %v396_v51 = vadd.f32 %v395_v12, %v394_v46  ;;  %v403_v30 = vadd.f32 %v402_v13, %v401_v2  ;;  %v410_v11 = vadd.f32 %v409_v14, %v408_v54  ;;  %v370_v24 = vadd.f32 %v369_v18, %v368_v37 }
  0x44   :  { %v417_v29 = vadd.f32 %v416_v15, %v415_v5  ;;  %v377_v59 = vadd.f32 %v376_v50, %v375_v53  ;;  %v384_v34 = vadd.f32 %v383_v19, %v382_v6  ;;  %v391_v49 = vadd.f32 %v390_v58, %v389_v45 }
  0x45   :  { %v397_v42 = vrot.slane %v396_v51, 1  ;;  %v404_v57 = vrot.slane %v403_v30, 1  ;;  %v411_v60 = vrot.slane %v410_v11, 1  ;;  %v421_v32 = vmul.f32 0.5, %v1060_v7 }
  0x46   :  { %v418_v61 = vrot.slane %v417_v29, 1  ;;  %v422_v38 = vmul.f32 0.5, %v1062_v8  ;;  %v423_v33 = vmul.f32 0.5, %v1064_v9  ;;  %v424_v39 = vmul.f32 0.5, %v1066_v10 }
  0x47   :  { %v398_v40 = vadd.f32 %v397_v42, %v396_v51  ;;  %v405_v52 = vadd.f32 %v404_v57, %v403_v30  ;;  %v412_v41 = vadd.f32 %v411_v60, %v410_v11  ;;  %v425_v46 = vmul.f32 0.5, %v1080_v20 }
  0x48   :  { %v419_v1 = vadd.f32 %v418_v61, %v417_v29  ;;  %v426_v2 = vmul.f32 0.5, %v1082_v21  ;;  %v427_v54 = vmul.f32 0.5, %v1084_v22  ;;  %v428_v7 = vmul.f32 0.5, %v1086_v23  ;;  %v938_v22 = vld [vmem:[%s1337_s1] ss:$8 sps:$4 sm:$0xff]  }
  0x49   :  { %v429_v8 = vmul.f32 0.5, %v1100_v31  ;;  %v430_v9 = vmul.f32 0.5, %v1102_v35  ;;  %v431_v10 = vmul.f32 0.5, %v1104_v0  ;;  %v432_v5 = vmul.f32 0.5, %v1106_v43  ;;  %v940_v43 = vld [vmem:[%s1337_s1 + $0x10] ss:$8 sps:$4 sm:$0xff]  }
  0x4a   :  { %v433_v11 = vmul.f32 0.5, %v1120_v62  ;;  %v434_v29 = vmul.f32 0.5, %v1122_v36  ;;  %v435_v20 = vmul.f32 0.5, %v1124_v63  ;;  %v436_v21 = vmul.f32 0.5, %v1126_v44 }
  0x4b   :  { %v437_v23 = vmul.f32 0.5, %v1140_v3  ;;  %v438_v31 = vmul.f32 0.5, %v1142_v47  ;;  %v439_v35 = vmul.f32 0.5, %v1144_v55  ;;  %v440_v0 = vmul.f32 0.5, %v1146_v4 }
  0x4c   :  { %v441_v62 = vmul.f32 0.5, %v1160_v16  ;;  %v442_v36 = vmul.f32 0.5, %v1162_v48  ;;  %v443_v63 = vmul.f32 0.5, %v1164_v17  ;;  %v444_v44 = vmul.f32 0.5, %v1166_v56 }
  0x4d   :  { %v445_v37 = vmul.f32 0.5, %v370_v24  ;;  %v446_v3 = vmul.f32 0.5, %v377_v59  ;;  %v447_v53 = vmul.f32 0.5, %v384_v34  ;;  %v448_v47 = vmul.f32 0.5, %v391_v49 }
  0x4e   :  { %v449_v6 = vmul.f32 0.5, %v398_v40  ;;  %v450_v55 = vmul.f32 0.5, %v405_v52  ;;  %v451_v45 = vmul.f32 0.5, %v412_v41  ;;  %v452_v4 = vmul.f32 0.5, %v419_v1 }
  0x4f   :  { %v471_v12 = vrot.slane %v938_v22, %v993_v26  ;;  %v485_v13 = vrot.slane %v940_v43, %v993_v26  ;;  %v722_v16 = vsel %vm721_vm1, %v425_v46, %v421_v32  ;;  %vm731_vm6 = vcmask 1046534   ;;  %v942_v22 = vld [vmem:[%s1337_s1 + $0x4] ss:$8 sps:$4 sm:$0xff]  }
  0x50   :  { %v724_v48 = vsel %vm723_vm2, %v429_v8, %v722_v16  ;;  %vm733_vm7 = vcmask 1047559   ;;  %v735_v17 = vsel %vm721_vm1, %v426_v2, %v422_v38  ;;  %v742_v18 = vsel %vm721_vm1, %v427_v54, %v423_v33  ;;  %v1346_v33 = vld [vmem:[#allocation3_spill] sm:$0xff] }
  0x51   :  { %v493_v56 = vcombine.low %v471_v12, %v485_v13  ;;  %v726_v14 = vsel %vm725_vm3, %v433_v11, %v724_v48  ;;  %v736_v15 = vsel %vm723_vm2, %v430_v9, %v735_v17  ;;  %v743_v58 = vsel %vm723_vm2, %v431_v10, %v742_v18 }
  0x52   :  { %v728_v50 = vsel %vm727_vm4, %v437_v23, %v726_v14  ;;  %v737_v19 = vsel %vm725_vm3, %v434_v29, %v736_v15  ;;  %v749_v51 = vsel %vm721_vm1, %v428_v7, %v424_v39  ;;  %v744_v34 = vsel %vm725_vm3, %v435_v20, %v743_v58 }
  0x53   :  { %v503_v30 = vrot.slane %v493_v56, %v993_v26  ;;  %v730_v24 = vsel %vm729_vm5, %v441_v62, %v728_v50  ;;  %v738_v59 = vsel %vm727_vm4, %v438_v31, %v737_v19  ;;  %v745_v57 = vsel %vm727_vm4, %v439_v35, %v744_v34 }
  0x54   :  { %v732_v49 = vsel %vm731_vm6, %v445_v37, %v730_v24  ;;  %v739_v42 = vsel %vm729_vm5, %v442_v36, %v738_v59  ;;  %v750_v60 = vsel %vm723_vm2, %v432_v5, %v749_v51  ;;  %v746_v41 = vsel %vm729_vm5, %v443_v63, %v745_v57 }
  0x55   :  { %v532_v61 = vrot.slane %v503_v30, %v990_v25  ;;  %v536_v32 = vrot.slane %v503_v30, %v996_v27  ;;  %v540_v38 = vrot.slane %v503_v30, %v999_v28  ;;  %v544_v39 = vrot.slane %v503_v30, %v1346_v33 }
  0x56   :  { %v1235_v40 = vsel %vm733_vm7, %v449_v6, %v732_v49  ;;  %v740_v52 = vsel %vm731_vm6, %v446_v3, %v739_v42  ;;  %v751_v1 = vsel %vm725_vm3, %v436_v21, %v750_v60  ;;  %v747_v2 = vsel %vm731_vm6, %v447_v53, %v746_v41 }
  0x57   :  { %v1241_v46 = vsel %vm733_vm7, %v450_v55, %v740_v52  ;;  %v752_v54 = vsel %vm727_vm4, %v440_v0, %v751_v1  ;;  %v760_v7 = vsub.f32 %v532_v61, %v1235_v40  ;;  %v1247_v8 = vsel %vm733_vm7, %v451_v45, %v747_v2  ;;  %v943_v45 = vld [vmem:[%s1337_s1 + $0x14] ss:$8 sps:$4 sm:$0xff]  }
  0x58   :  { %v753_v9 = vsel %vm729_vm5, %v444_v44, %v752_v54  ;;  %v761_v10 = vsub.f32 %v536_v32, %v1241_v46  ;;  %v525_v5 = vcombine.high %v503_v30, %v503_v30  ;;  %v762_v29 = vsub.f32 %v540_v38, %v1247_v8 }
  0x59   :  { %v754_v11 = vsel %vm731_vm6, %v448_v47, %v753_v9  ;;  %v792_v20 = vmul.f32 %v760_v7, %v760_v7  ;;  %v494_v21 = vcombine.high %v471_v12, %v485_v13  ;;  %v492_v59 = vrot.slane %v943_v45, %v993_v26 }
  0x5a   :  { %v1257_v23 = vsel %vm733_vm7, %v452_v4, %v754_v11  ;;  %v793_v31 = vmul.f32 %v761_v10, %v761_v10  ;;  %v564_v35 = vrot.slane %v525_v5, %v990_v25  ;;  %v568_v0 = vrot.slane %v525_v5, %v996_v27 }
  0x5b   :  { %v763_v43 = vsub.f32 %v544_v39, %v1257_v23  ;;  %v794_v62 = vmul.f32 %v762_v29, %v762_v29  ;;  %v572_v36 = vrot.slane %v525_v5, %v999_v28  ;;  %v576_v63 = vrot.slane %v525_v5, %v1346_v33 }
  0x5c   :  { %v824_v44 = vadd.f32 %v793_v31, %v792_v20  ;;  %v768_v37 = vsub.f32 %v564_v35, %v1235_v40  ;;  %v769_v3 = vsub.f32 %v568_v0, %v1241_v46  ;;  %v517_v53 = vrot.slane %v494_v21, %v993_v26 }
  0x5d   :  { %v795_v47 = vmul.f32 %v763_v43, %v763_v43  ;;  %v770_v6 = vsub.f32 %v572_v36, %v1247_v8  ;;  %v771_v55 = vsub.f32 %v576_v63, %v1257_v23  ;;  %v478_v4 = vrot.slane %v942_v22, %v993_v26 }
  0x5e   :  { %v825_v12 = vadd.f32 %v824_v44, %v794_v62  ;;  %v800_v13 = vmul.f32 %v768_v37, %v768_v37  ;;  %v801_v16 = vmul.f32 %v769_v3, %v769_v3  ;;  %v548_v48 = vrot.slane %v517_v53, %v990_v25 }
  0x5f   :  { %v802_v17 = vmul.f32 %v770_v6, %v770_v6  ;;  %v803_v56 = vmul.f32 %v771_v55, %v771_v55  ;;  %v552_v14 = vrot.slane %v517_v53, %v996_v27  ;;  %v556_v15 = vrot.slane %v517_v53, %v999_v28 }
  0x60   :  { %v826_v18 = vadd.f32 %v825_v12, %v795_v47  ;;  %v834_v50 = vadd.f32 %v801_v16, %v800_v13  ;;  %v560_v19 = vrot.slane %v517_v53, %v1346_v33  ;;  %v764_v58 = vsub.f32 %v548_v48, %v1235_v40 }
  0x61   :  { %v765_v51 = vsub.f32 %v552_v14, %v1241_v46  ;;  %v766_v30 = vsub.f32 %v556_v15, %v1247_v8  ;;  %v527_v24 = vcombine.high %v517_v53, %v517_v53  ;;  %v495_v7 = vcombine.low %v478_v4, %v492_v59 }
  0x62   :  { %827 = vadd.xlane.f32.xlu0 %v826_v18  ;;  %v835_v34 = vadd.f32 %v834_v50, %v802_v17  ;;  %v767_v49 = vsub.f32 %v560_v19, %v1257_v23  ;;  %v796_v42 = vmul.f32 %v764_v58, %v764_v58  ;;  %v496_v5 = vcombine.high %v478_v4, %v492_v59 }
  0x63   :  { %v797_v57 = vmul.f32 %v765_v51, %v765_v51  ;;  %v798_v60 = vmul.f32 %v766_v30, %v766_v30  ;;  %v580_v61 = vrot.slane %v527_v24, %v990_v25  ;;  %v584_v32 = vrot.slane %v527_v24, %v996_v27 }
  0x64   :  { %v836_v38 = vadd.f32 %v835_v34, %v803_v56  ;;  %v799_v39 = vmul.f32 %v767_v49, %v767_v49  ;;  %v588_v52 = vrot.slane %v527_v24, %v999_v28  ;;  %v592_v41 = vrot.slane %v527_v24, %v1346_v33 }
  0x65   :  { %v829_v1 = vadd.f32 %v797_v57, %v796_v42  ;;  %v772_v2 = vsub.f32 %v580_v61, %v1235_v40  ;;  %v773_v54 = vsub.f32 %v584_v32, %v1241_v46  ;;  %v510_v21 = vrot.slane %v495_v7, %v993_v26 }
  0x66   :  { %837 = vadd.xlane.f32.xlu1 %v836_v38  ;;  %v774_v9 = vsub.f32 %v588_v52, %v1247_v8  ;;  %v775_v10 = vsub.f32 %v592_v41, %v1257_v23  ;;  %v524_v35 = vrot.slane %v496_v5, %v993_v26  ;;  %vm922_vm8 = vcmask 64512  }
  0x67   :  { %v830_v11 = vadd.f32 %v829_v1, %v798_v60  ;;  %v804_v29 = vmul.f32 %v772_v2, %v772_v2  ;;  %v805_v20 = vmul.f32 %v773_v54, %v773_v54  ;;  %v596_v62 = vrot.slane %v510_v21, %v990_v25 }
  0x68   :  { %v806_v22 = vmul.f32 %v774_v9, %v774_v9  ;;  %v807_v31 = vmul.f32 %v775_v10, %v775_v10  ;;  %v600_v36 = vrot.slane %v510_v21, %v996_v27  ;;  %v604_v63 = vrot.slane %v510_v21, %v999_v28 }
  0x69   :  { %v831_v0 = vadd.f32 %v830_v11, %v799_v39  ;;  %v839_v43 = vadd.f32 %v805_v20, %v804_v29  ;;  %v608_v44 = vrot.slane %v510_v21, %v1346_v33  ;;  %v612_v37 = vrot.slane %v524_v35, %v990_v25 }
  0x6a   :  { %v616_v3 = vrot.slane %v524_v35, %v996_v27  ;;  %v776_v47 = vsub.f32 %v596_v62, %v1235_v40  ;;  %v777_v26 = vsub.f32 %v600_v36, %v1241_v46  ;;  %v620_v6 = vrot.slane %v524_v35, %v999_v28 }
  0x6b   :  { %832 = vadd.xlane.f32.xlu0 %v831_v0  ;;  %v840_v53 = vadd.f32 %v839_v43, %v806_v22  ;;  %v778_v55 = vsub.f32 %v604_v63, %v1247_v8  ;;  %v779_v45 = vsub.f32 %v608_v44, %v1257_v23  ;;  %v624_v4 = vrot.slane %v524_v35, %v1346_v33 }
  0x6c   :  { %v780_v12 = vsub.f32 %v612_v37, %v1235_v40  ;;  %v808_v16 = vmul.f32 %v776_v47, %v776_v47  ;;  %v809_v48 = vmul.f32 %v777_v26, %v777_v26  ;;  %v781_v17 = vsub.f32 %v616_v3, %v1241_v46  ;;  %v1348_v47 = vld [vmem:[#allocation2_spill] sm:$0xff] }
  0x6d   :  { %v841_v13 = vadd.f32 %v840_v53, %v807_v31  ;;  %v810_v56 = vmul.f32 %v778_v55, %v778_v55  ;;  %v811_v14 = vmul.f32 %v779_v45, %v779_v45  ;;  %v782_v15 = vsub.f32 %v620_v6, %v1247_v8 }
  0x6e   :  { %v783_v18 = vsub.f32 %v624_v4, %v1257_v23  ;;  %v844_v50 = vadd.f32 %v809_v48, %v808_v16  ;;  %v812_v19 = vmul.f32 %v780_v12, %v780_v12  ;;  %v813_v58 = vmul.f32 %v781_v17, %v781_v17 }
  0x6f   :  { %842 = vadd.xlane.f32.xlu1 %v841_v13  ;;  %v526_v51 = vcombine.high %v510_v21, %v510_v21  ;;  %v814_v30 = vmul.f32 %v782_v15, %v782_v15  ;;  %v528_v59 = vcombine.high %v524_v35, %v524_v35  ;;  %v1347_v37 = vlaneseq }
  0x70   :  { %v815_v24 = vmul.f32 %v783_v18, %v783_v18  ;;  %v845_v34 = vadd.f32 %v844_v50, %v810_v56  ;;  %v849_v49 = vadd.f32 %v813_v58, %v812_v19 }
  0x71   :  { %v628_v42 = vrot.slane %v526_v51, %v990_v25  ;;  %v632_v57 = vrot.slane %v526_v51, %v996_v27  ;;  %v636_v60 = vrot.slane %v526_v51, %v999_v28  ;;  %v640_v61 = vrot.slane %v526_v51, %v1346_v33 }
  0x72   :  { %v644_v32 = vrot.slane %v528_v59, %v990_v25  ;;  %v648_v38 = vrot.slane %v528_v59, %v996_v27  ;;  %v846_v39 = vadd.f32 %v845_v34, %v811_v14  ;;  %v850_v52 = vadd.f32 %v849_v49, %v814_v30 }
  0x73   :  { %v784_v41 = vsub.f32 %v628_v42, %v1235_v40  ;;  %v785_v1 = vsub.f32 %v632_v57, %v1241_v46  ;;  %v786_v2 = vsub.f32 %v636_v60, %v1247_v8  ;;  %v787_v54 = vsub.f32 %v640_v61, %v1257_v23 }
  0x74   :  { %v652_v7 = vrot.slane %v528_v59, %v999_v28  ;;  %v656_v9 = vrot.slane %v528_v59, %v1346_v33  ;;  %847 = vadd.xlane.f32.xlu0 %v846_v39  ;;  %v851_v10 = vadd.f32 %v850_v52, %v815_v24  ;;  %v788_v27 = vsub.f32 %v644_v32, %v1235_v40 }
  0x75   :  { %v816_v5 = vmul.f32 %v784_v41, %v784_v41  ;;  %v817_v25 = vmul.f32 %v785_v1, %v785_v1  ;;  %v818_v11 = vmul.f32 %v786_v2, %v786_v2  ;;  %v789_v29 = vsub.f32 %v648_v38, %v1241_v46 }
  0x76   :  { %v790_v20 = vsub.f32 %v652_v7, %v1247_v8  ;;  %852 = vadd.xlane.f32.xlu1 %v851_v10  ;;  %v819_v21 = vmul.f32 %v787_v54, %v787_v54  ;;  %v791_v31 = vsub.f32 %v656_v9, %v1257_v23  ;;  %v820_v35 = vmul.f32 %v788_v27, %v788_v27 }
  0x77   :  { %v854_v22 = vadd.f32 %v817_v25, %v816_v5  ;;  %v821_v28 = vmul.f32 %v789_v29, %v789_v29  ;;  %v881_v8 = vand.u32 127, %v1347_v37 }
  0x78   :  { %v822_v0 = vmul.f32 %v790_v20, %v790_v20  ;;  %v823_v43 = vmul.f32 %v791_v31, %v791_v31 }
  0x79   :  { %v855_v33 = vadd.f32 %v854_v22, %v818_v11  ;;  %v859_v62 = vadd.f32 %v821_v28, %v820_v35  ;;  %v884_v26 = vsub.s32 %v881_v8, %v1348_v47 }
  0x7b   :  { %v856_v36 = vadd.f32 %v855_v33, %v819_v21  ;;  %v860_v63 = vadd.f32 %v859_v62, %v822_v0 }
  0x7d   :  { %857 = vadd.xlane.f32.xlu0 %v856_v36  ;;  %v861_v40 = vadd.f32 %v860_v63, %v823_v43 }
  0x7f   :  { %862 = vadd.xlane.f32.xlu1 %v861_v40 }
  0xef   :  { %v828_v44 = vpop.xlane.xlu0 %827 }
  0xf0   :  { %v864_v23 = vsub.f32 0.0, %v828_v44 }
  0xf2   :  { %v885_v4 = vrot.slane %v864_v23, %v884_v26 }
  0xf3   :  { %v838_v46 = vpop.xlane.xlu1 %837 }
  0xf4   :  { %v866_v45 = vsub.f32 0.0, %v838_v46 }
  0xf6   :  { %v893_v48 = vrot.slane %v866_v45, %v884_v26 }
  0xf8   :  { %v833_v3 = vpop.xlane.xlu0 %832 }
  0xf9   :  { %v865_v53 = vsub.f32 0.0, %v833_v3 }
  0xfb   :  { %v889_v55 = vrot.slane %v865_v53, %v884_v26 }
  0xfc   :  { %v843_v6 = vpop.xlane.xlu1 %842 }
  0xfd   :  { %v867_v12 = vsub.f32 0.0, %v843_v6  ;;  %v914_v13 = vsel %vm721_vm1, %v889_v55, %v885_v4 }
  0xfe   :  { %v915_v15 = vsel %vm723_vm2, %v893_v48, %v914_v13 }
  0xff   :  { %v897_v56 = vrot.slane %v867_v12, %v884_v26 }
 0x101   :  { %v848_v16 = vpop.xlane.xlu0 %847  ;;  %v916_v19 = vsel %vm725_vm3, %v897_v56, %v915_v15 }
 0x102   :  { %v868_v17 = vsub.f32 0.0, %v848_v16 }
 0x103   :  { %v853_v14 = vpop.xlane.xlu1 %852 }
 0x104   :  { %v869_v18 = vsub.f32 0.0, %v853_v14  ;;  %v901_v50 = vrot.slane %v868_v17, %v884_v26 }
 0x106   :  { %v905_v58 = vrot.slane %v869_v18, %v884_v26  ;;  %v917_v30 = vsel %vm727_vm4, %v901_v50, %v916_v19 }
 0x108   :  { %v918_v49 = vsel %vm729_vm5, %v905_v58, %v917_v30 }
 0x10a   :  { %v858_v51 = vpop.xlane.xlu0 %857 }
 0x10b   :  { %v870_v24 = vsub.f32 0.0, %v858_v51 }
 0x10c   :  { %v863_v34 = vpop.xlane.xlu1 %862 }
 0x10d   :  { %v909_v59 = vrot.slane %v870_v24, %v884_v26  ;;  %v871_v42 = vsub.f32 0.0, %v863_v34 }
 0x10f   :  { %v919_v57 = vsel %vm731_vm6, %v909_v59, %v918_v49  ;;  %v913_v60 = vrot.slane %v871_v42, %v884_v26 }
 0x111   :  { %v920_v61 = vsel %vm733_vm7, %v913_v60, %v919_v57 }
 0x112   :  { %923 = vst.msk [vmem:[%s1338_s2] sm:$0xff] %vm922_vm8, %v920_v61 }

// kernel: protonet_forward.2
= control target key start
LH: loop header
LB: loop body
LE: loop exit
PB: predicated region body
PF: predicated region fallthrough
CT: control target
= control target key end

     0   :  { %s4779_s12 = smov 0   ;;  %s5954_s0 = inlined_call_operand.vmem [shape: bf16[2,4,48,216], index: 0, kind: input, shape index: {}]   ;;  %s5955_s1 = inlined_call_operand.vmem [shape: bf16[216,128], index: 1, kind: input, shape index: {}]   ;;  %s5956_s2 = inlined_call_operand.vmem [shape: bf16[2,9,64,128], index: 2, kind: input, shape index: {}]   ;;  %s5957_s3 = inlined_call_operand.vmem [shape: bf16[2,24,128], index: 3, kind: output, shape index: {}]  }
   0x1 LB: > { %s3427_s13 = sadd.s32 4294967295, %s4755_s12   ;;  %p3431_p0 = scmp.ge.s32.totalorder %s4755_s12, 1  ;;  %s4755_s12 = sphi %s4779_s12, %s13_s12  }
   0x2   : > { %p137_p1 = scmp.lt.s32.totalorder %s4755_s12, 3 }
   0x4   : > { %p138_p2 = pnand %p3431_p0, %p137_p1 }
   0x6   : > { %141 = sbr.rel (%p138_p2) target bundleno = 978 (0x3d2), region = 32 }
   0xd   : > { %v4790_v0 = vld [vmem:[%s5955_s1] sm:$0xff]   ;;  %v4757_v1 = vmov 0   ;;  %v4799_v2 = vld [vmem:[%s5955_s1 + $0x8] sm:$0xff]   ;;  %p161_p3 = scmp.lt.s32.totalorder %s3427_s13, 1  ;;  %v4810_v3 = vld [vmem:[%s5955_s1 + $0x10] sm:$0xff]   ;;  %vm313_vm0 = vcmask 719872  }
   0xe   : > { %327 = vmatprep.subr.bf16.mxu0 %v4757_v1  ;;  %427 = vmatprep.subr.bf16.mxu1 %v4757_v1  ;;  %v4820_v4 = vld [vmem:[%s5955_s1 + $0x18] sm:$0xff]   ;;  %v4834_v5 = vld [vmem:[%s5955_s1 + $0x20] sm:$0xff]   ;;  %v4846_v8 = vld [vmem:[%s5955_s1 + $0x28] sm:$0xff]   ;;  %vm323_vm1 = vcmask 1043456   ;;  %vm711_vm2 = vcmask 519168   ;;  %vm715_vm3 = vcmask 518144  }
   0xf   : > { %328 = vmatpush1.bf16.msra.mxu0 %v4790_v0  ;;  %428 = vmatpush1.bf16.msra.mxu1 %v4790_v0  ;;  %s6036_s13 = smov (!%p161_p3, %s3427_s13), 1  ;;  %v4856_v9 = vld [vmem:[%s5955_s1 + $0x30] sm:$0xff]   ;;  %v4624_v10 = vld [vmem:[%s5955_s1 + $0x68] ss:$0 sps:$4 sm:$0xff]   ;;  %v4868_v11 = vld [vmem:[%s5955_s1 + $0x38] sm:$0xff]   ;;  %vm737_vm4 = vcmask 1042432  }
  0x10   : > { %329 = vmatprep.subr.bf16.mxu0 %v4757_v1  ;;  %429 = vmatprep.subr.bf16.mxu1 %v4757_v1  ;;  %s4599_s20 = smul.u32 192, %s6036_s13  ;;  %v4875_v12 = vld [vmem:[%s5955_s1 + $0x40] sm:$0xff]   ;;  %v4877_v13 = vsel %vm323_vm1, %v4624_v10, 0  ;;  %v4886_v14 = vld [vmem:[%s5955_s1 + $0x48] sm:$0xff]   ;;  %v4895_v15 = vld [vmem:[%s5955_s1 + $0x50] sm:$0xff]   ;;  %vm738_vm5 = vcmask 1046532  }
  0x11   : > { %v4904_v16 = vld [vmem:[%s5955_s1 + $0x58] sm:$0xff]   ;;  %v4913_v17 = vld [vmem:[%s5955_s1 + $0x60] sm:$0xff]   ;;  %721 = vst.msk [vmem:[#allocation2 + $0x20] sm:$0xf] %vm711_vm2, %v4757_v1  ;;  %712 = vst.msk [vmem:[#allocation2] sm:$0xf] %vm711_vm2, %v4757_v1 }
  0x12   : > { %s4827_s25 = scalar_lea.vmem %s5954_s0, %s4599_s20  ;;  %713 = vst.msk [vmem:[#allocation2 + $0x4] sm:$0xf] %vm711_vm2, %v4757_v1  ;;  %714 = vst.msk [vmem:[#allocation2 + $0x8] sm:$0xf] %vm711_vm2, %v4757_v1  ;;  %v5040_v40 = vld [vmem:[%s5956_s2 + $0x140] sm:$0xff]   ;;  %v5047_v41 = vld [vmem:[%s5956_s2 + $0x148] sm:$0xff]  }
  0x13   : > { %330 = vmatpush1.bf16.msra.mxu0 %v4799_v2  ;;  %430 = vmatpush1.bf16.msra.mxu1 %v4799_v2  ;;  %v4627_v6 = vld [vmem:[%s4827_s25 + $0x4] ss:$8 sps:$4 sm:$0xff]   ;;  %v4630_v7 = vld [vmem:[%s4827_s25 + $0x34] ss:$8 sps:$4 sm:$0xff]   ;;  %v4625_v18 = vld [vmem:[%s4827_s25] ss:$8 sps:$4 sm:$0xff]  }
  0x14   : > { %331 = vmatprep.subr.bf16.mxu0 %v4757_v1  ;;  %431 = vmatprep.subr.bf16.mxu1 %v4757_v1  ;;  %v4628_v19 = vld [vmem:[%s4827_s25 + $0x30] ss:$8 sps:$4 sm:$0xff]   ;;  %v4631_v20 = vld [vmem:[%s4827_s25 + $0x14] ss:$8 sps:$4 sm:$0xff]   ;;  %v4633_v21 = vld [vmem:[%s4827_s25 + $0x44] ss:$8 sps:$4 sm:$0xff]  }
  0x15   : > { %3454 = vmatprep.mubr.msk.bf16.mxu0 %vm313_vm0, %v4627_v6  ;;  %3469 = vmatprep.mubr.msk.bf16.mxu1 %vm313_vm0, %v4630_v7  ;;  %v4635_v22 = vld [vmem:[%s4827_s25 + $0x10] ss:$8 sps:$4 sm:$0xff]   ;;  %v4636_v23 = vld [vmem:[%s4827_s25 + $0x40] ss:$8 sps:$4 sm:$0xff]   ;;  %v4637_v24 = vld [vmem:[%s4827_s25 + $0x24] ss:$8 sps:$4 sm:$0xff]  }
  0x16   : > { %v4639_v25 = vld [vmem:[%s4827_s25 + $0x54] ss:$8 sps:$4 sm:$0xff]   ;;  %v4641_v26 = vld [vmem:[%s4827_s25 + $0x20] ss:$8 sps:$4 sm:$0xff]   ;;  %v4642_v27 = vld [vmem:[%s4827_s25 + $0x50] ss:$8 sps:$4 sm:$0xff]  }
  0x17   : > { %332 = vmatpush1.bf16.msra.mxu0 %v4810_v3  ;;  %432 = vmatpush1.bf16.msra.mxu1 %v4810_v3  ;;  %v4645_v28 = vld [vmem:[%s4827_s25 + $0x64] ss:$8 sps:$4 sm:$0xff]   ;;  %v4648_v29 = vld [vmem:[%s4827_s25 + $0x94] ss:$8 sps:$4 sm:$0xff]   ;;  %v4643_v30 = vld [vmem:[%s4827_s25 + $0x60] ss:$8 sps:$4 sm:$0xff]  }
  0x18   : > { %333 = vmatprep.subr.bf16.mxu0 %v4757_v1  ;;  %433 = vmatprep.subr.bf16.mxu1 %v4757_v1  ;;  %v4646_v31 = vld [vmem:[%s4827_s25 + $0x90] ss:$8 sps:$4 sm:$0xff]   ;;  %v4649_v32 = vld [vmem:[%s4827_s25 + $0x74] ss:$8 sps:$4 sm:$0xff]   ;;  %v4651_v33 = vld [vmem:[%s4827_s25 + $0xa4] ss:$8 sps:$4 sm:$0xff]  }
  0x19   : > { %v4653_v34 = vld [vmem:[%s4827_s25 + $0x70] ss:$8 sps:$4 sm:$0xff]   ;;  %v4654_v35 = vld [vmem:[%s4827_s25 + $0xa0] ss:$8 sps:$4 sm:$0xff]   ;;  %v4655_v36 = vld [vmem:[%s4827_s25 + $0x84] ss:$8 sps:$4 sm:$0xff]  }
  0x1a   : > { %v4657_v37 = vld [vmem:[%s4827_s25 + $0xb4] ss:$8 sps:$4 sm:$0xff]   ;;  %v4659_v38 = vld [vmem:[%s4827_s25 + $0x80] ss:$8 sps:$4 sm:$0xff]   ;;  %v4660_v39 = vld [vmem:[%s4827_s25 + $0xb0] ss:$8 sps:$4 sm:$0xff]  }
  0x1b   : > { %334 = vmatpush1.bf16.msra.mxu0 %v4820_v4  ;;  %434 = vmatpush1.bf16.msra.mxu1 %v4820_v4  ;;  %717 = vst.msk [vmem:[#allocation2 + $0x10] sm:$0xf] %vm711_vm2, %v4757_v1  ;;  %718 = vst.msk [vmem:[#allocation2 + $0x14] sm:$0xf] %vm711_vm2, %v4757_v1  ;;  %v5054_v42 = vld [vmem:[%s5956_s2 + $0x150] sm:$0xff]   ;;  %v5069_v43 = vld [vmem:[%s5956_s2 + $0x158] sm:$0xff]  }
  0x1c   : > { %335 = vmatprep.subr.bf16.mxu0 %v4757_v1  ;;  %435 = vmatprep.subr.bf16.mxu1 %v4757_v1  ;;  %719 = vst.msk [vmem:[#allocation2 + $0x18] sm:$0xf] %vm711_vm2, %v4757_v1  ;;  %722 = vst.msk [vmem:[#allocation2 + $0x24] sm:$0xf] %vm711_vm2, %v4757_v1  ;;  %v5076_v44 = vld [vmem:[%s5956_s2 + $0x20] sm:$0xff]   ;;  %vm752_vm6 = vcmask 519171  }
  0x1d   : > { %723 = vst.msk [vmem:[#allocation2 + $0x28] sm:$0xf] %vm711_vm2, %v4757_v1  ;;  %725 = vst.msk [vmem:[#allocation2 + $0x30] sm:$0xf] %vm711_vm2, %v4757_v1  ;;  %s4758_s14 = smov 64   ;;  %vm1014_vm8 = vcmask 523264  }
  0x1e   : > { %726 = vst.msk [vmem:[#allocation2 + $0x34] sm:$0xf] %vm711_vm2, %v4757_v1  ;;  %727 = vst.msk [vmem:[#allocation2 + $0x38] sm:$0xf] %vm711_vm2, %v4757_v1  ;;  %vm1489_vm9 = vcmask 1044480   ;;  %s4600_s16 = smul.u32 12, %s6036_s13 }
  0x1f   : > { %336 = vmatpush1.bf16.msra.mxu0 %v4834_v5  ;;  %436 = vmatpush1.bf16.msra.mxu1 %v4834_v5  ;;  %716 = vst.msk [vmem:[#allocation2 + $0xc] sm:$0x7] %vm715_vm3, %v4757_v1  ;;  %724 = vst.msk [vmem:[#allocation2 + $0x2c] sm:$0x7] %vm715_vm3, %v4757_v1 }
  0x20   : > { %337 = vmatprep.subr.bf16.mxu0 %v4757_v1  ;;  %437 = vmatprep.subr.bf16.mxu1 %v4757_v1  ;;  %728 = vst.msk [vmem:[#allocation2 + $0x3c] sm:$0x7] %vm715_vm3, %v4757_v1  ;;  %720 = vst.msk [vmem:[#allocation2 + $0x1c] sm:$0x7] %vm715_vm3, %v4757_v1  ;;  %s170_s19 = scalar_lea.vmem %s5957_s3, %s4600_s16 }
  0x21   : > { %vm5124_vm7 = vmor %vm737_vm4, %vm738_vm5 }
  0x23   : > { %338 = vmatpush1.bf16.msra.mxu0 %v4846_v8  ;;  %438 = vmatpush1.bf16.msra.mxu1 %v4846_v8 }
  0x24   : > { %339 = vmatprep.subr.bf16.mxu0 %v4757_v1  ;;  %439 = vmatprep.subr.bf16.mxu1 %v4757_v1 }
  0x27   : > { %340 = vmatpush1.bf16.msra.mxu0 %v4856_v9  ;;  %440 = vmatpush1.bf16.msra.mxu1 %v4856_v9 }
  0x28   : > { %341 = vmatprep.subr.bf16.mxu0 %v4757_v1  ;;  %441 = vmatprep.subr.bf16.mxu1 %v4757_v1 }
  0x2b   : > { %342 = vmatpush1.bf16.msra.mxu0 %v4868_v11  ;;  %442 = vmatpush1.bf16.msra.mxu1 %v4868_v11 }
  0x2c   : > { %343 = vmatprep.subr.bf16.mxu0 %v4757_v1  ;;  %443 = vmatprep.subr.bf16.mxu1 %v4757_v1 }
  0x2f   : > { %344 = vmatpush1.bf16.msra.mxu0 %v4875_v12  ;;  %444 = vmatpush1.bf16.msra.mxu1 %v4875_v12 }
  0x30   : > { %345 = vmatprep.subr.bf16.mxu0 %v4757_v1  ;;  %445 = vmatprep.subr.bf16.mxu1 %v4757_v1 }
  0x33   : > { %346 = vmatpush1.bf16.msra.mxu0 %v4886_v14  ;;  %446 = vmatpush1.bf16.msra.mxu1 %v4886_v14 }
  0x34   : > { %347 = vmatprep.subr.bf16.mxu0 %v4757_v1  ;;  %447 = vmatprep.subr.bf16.mxu1 %v4757_v1 }
  0x37   : > { %348 = vmatpush1.bf16.msra.mxu0 %v4895_v15  ;;  %448 = vmatpush1.bf16.msra.mxu1 %v4895_v15 }
  0x38   : > { %349 = vmatprep.subr.bf16.mxu0 %v4757_v1  ;;  %449 = vmatprep.subr.bf16.mxu1 %v4757_v1 }
  0x3b   : > { %350 = vmatpush1.bf16.msra.mxu0 %v4904_v16  ;;  %450 = vmatpush1.bf16.msra.mxu1 %v4904_v16 }
  0x3c   : > { %351 = vmatprep.subr.bf16.mxu0 %v4757_v1  ;;  %451 = vmatprep.subr.bf16.mxu1 %v4757_v1 }
  0x3f   : > { %352 = vmatpush1.bf16.msra.mxu0 %v4913_v17  ;;  %452 = vmatpush1.bf16.msra.mxu1 %v4913_v17 }
  0x40   : > { %353 = vmatprep.subr.bf16.mxu0 %v4757_v1  ;;  %453 = vmatprep.subr.bf16.mxu1 %v4757_v1 }
  0x43   : > { %354 = vmatpush1.bf16.msra.mxu0 %v4877_v13  ;;  %454 = vmatpush1.bf16.msra.mxu1 %v4877_v13 }
  0x44   : > { %527 = vmatprep.subr.bf16.mxu0 %v4757_v1  ;;  %627 = vmatprep.subr.bf16.mxu1 %v4757_v1 }
  0x46   : > { %360 = vmatmul.mubr.bf16.vlgmr.msra.gmra.mrb[0].mxu0 %v4625_v18  ;;  %460 = vmatmul.mubr.bf16.vlgmr.msra.gmra.mrb[0].mxu1 %v4628_v19 }
  0x47   : > { %528 = vmatpush1.bf16.msra.mxu0 %v4790_v0  ;;  %628 = vmatpush1.bf16.msra.mxu1 %v4790_v0 }
  0x48   : > { %529 = vmatprep.subr.bf16.mxu0 %v4757_v1  ;;  %629 = vmatprep.subr.bf16.mxu1 %v4757_v1 }
  0x49   : > { %3455 = vmatprep.mubr.msk.bf16.mxu0 %vm313_vm0, %v4631_v20  ;;  %3470 = vmatprep.mubr.msk.bf16.mxu1 %vm313_vm0, %v4633_v21  ;;  %v5114_v20 = vld [vmem:[%s5956_s2 + $0x30] sm:$0xff]  }
  0x4b   : > { %530 = vmatpush1.bf16.msra.mxu0 %v4799_v2  ;;  %630 = vmatpush1.bf16.msra.mxu1 %v4799_v2 }
  0x4c   : > { %531 = vmatprep.subr.bf16.mxu0 %v4757_v1  ;;  %631 = vmatprep.subr.bf16.mxu1 %v4757_v1 }
  0x4e   : > { %368 = vmatmul.mubr.bf16.gmra.mrb[4].mxu0 %v4635_v22  ;;  %468 = vmatmul.mubr.bf16.gmra.mrb[4].mxu1 %v4636_v23 }
  0x4f   : > { %532 = vmatpush1.bf16.msra.mxu0 %v4810_v3  ;;  %632 = vmatpush1.bf16.msra.mxu1 %v4810_v3 }
  0x50   : > { %533 = vmatprep.subr.bf16.mxu0 %v4757_v1  ;;  %633 = vmatprep.subr.bf16.mxu1 %v4757_v1 }
  0x51   : > { %3456 = vmatprep.mubr.msk.bf16.mxu0 %vm313_vm0, %v4637_v24  ;;  %3471 = vmatprep.mubr.msk.bf16.mxu1 %vm313_vm0, %v4639_v25 }
  0x53   : > { %534 = vmatpush1.bf16.msra.mxu0 %v4820_v4  ;;  %634 = vmatpush1.bf16.msra.mxu1 %v4820_v4 }
  0x54   : > { %535 = vmatprep.subr.bf16.mxu0 %v4757_v1  ;;  %635 = vmatprep.subr.bf16.mxu1 %v4757_v1 }
  0x56   : > { %376 = vmatmul.mubr.bf16.gmra.mrb[8].mxu0 %v4641_v26  ;;  %476 = vmatmul.mubr.bf16.gmra.mrb[8].mxu1 %v4642_v27 }
  0x57   : > { %536 = vmatpush1.bf16.msra.mxu0 %v4834_v5  ;;  %636 = vmatpush1.bf16.msra.mxu1 %v4834_v5 }
  0x58   : > { %537 = vmatprep.subr.bf16.mxu0 %v4757_v1  ;;  %637 = vmatprep.subr.bf16.mxu1 %v4757_v1 }
  0x59   : > { %3484 = vmatprep.mubr.msk.bf16.mxu0 %vm313_vm0, %v4645_v28  ;;  %3499 = vmatprep.mubr.msk.bf16.mxu1 %vm313_vm0, %v4648_v29  ;;  %v5121_v29 = vld [vmem:[%s5956_s2 + $0x38] sm:$0xff]  }
  0x5b   : > { %538 = vmatpush1.bf16.msra.mxu0 %v4846_v8  ;;  %638 = vmatpush1.bf16.msra.mxu1 %v4846_v8 }
  0x5c   : > { %539 = vmatprep.subr.bf16.mxu0 %v4757_v1  ;;  %639 = vmatprep.subr.bf16.mxu1 %v4757_v1 }
  0x5f   : > { %540 = vmatpush1.bf16.msra.mxu0 %v4856_v9  ;;  %640 = vmatpush1.bf16.msra.mxu1 %v4856_v9 }
  0x60   : > { %541 = vmatprep.subr.bf16.mxu0 %v4757_v1  ;;  %641 = vmatprep.subr.bf16.mxu1 %v4757_v1 }
  0x63   : > { %542 = vmatpush1.bf16.msra.mxu0 %v4868_v11  ;;  %642 = vmatpush1.bf16.msra.mxu1 %v4868_v11  ;;  %v5101_v11 = vld [vmem:[%s5956_s2 + $0x28] sm:$0xff]  }
  0x64   : > { %543 = vmatprep.subr.bf16.mxu0 %v4757_v1  ;;  %643 = vmatprep.subr.bf16.mxu1 %v4757_v1 }
  0x67   : > { %544 = vmatpush1.bf16.msra.mxu0 %v4875_v12  ;;  %644 = vmatpush1.bf16.msra.mxu1 %v4875_v12  ;;  %v5106_v12 = vld [vmem:[%s5956_s2 + $0x120] sm:$0xff]  }
  0x68   : > { %545 = vmatprep.subr.bf16.mxu0 %v4757_v1  ;;  %645 = vmatprep.subr.bf16.mxu1 %v4757_v1 }
  0x6b   : > { %546 = vmatpush1.bf16.msra.mxu0 %v4886_v14  ;;  %646 = vmatpush1.bf16.msra.mxu1 %v4886_v14 }
  0x6c   : > { %547 = vmatprep.subr.bf16.mxu0 %v4757_v1  ;;  %647 = vmatprep.subr.bf16.mxu1 %v4757_v1 }
  0x6f   : > { %548 = vmatpush1.bf16.msra.mxu0 %v4895_v15  ;;  %648 = vmatpush1.bf16.msra.mxu1 %v4895_v15 }
  0x70   : > { %549 = vmatprep.subr.bf16.mxu0 %v4757_v1  ;;  %649 = vmatprep.subr.bf16.mxu1 %v4757_v1 }
  0x73   : > { %550 = vmatpush1.bf16.msra.mxu0 %v4904_v16  ;;  %650 = vmatpush1.bf16.msra.mxu1 %v4904_v16 }
  0x74   : > { %551 = vmatprep.subr.bf16.mxu0 %v4757_v1  ;;  %651 = vmatprep.subr.bf16.mxu1 %v4757_v1 }
  0x77   : > { %552 = vmatpush1.bf16.msra.mxu0 %v4913_v17  ;;  %652 = vmatpush1.bf16.msra.mxu1 %v4913_v17 }
  0x78   : > { %553 = vmatprep.subr.bf16.mxu0 %v4757_v1  ;;  %653 = vmatprep.subr.bf16.mxu1 %v4757_v1 }
  0x7b   : > { %554 = vmatpush1.bf16.msra.mxu0 %v4877_v13  ;;  %654 = vmatpush1.bf16.msra.mxu1 %v4877_v13 }
  0x7c   : > { %4147 = vmatprep.subr.bf16.mxu1 %v5040_v40  ;;  %4039 = vmatprep.subr.bf16.mxu0 %v5076_v44 }
  0x7e   : > { %560 = vmatmul.mubr.bf16.vlgmr.msra.gmra.mrb[12].mxu0 %v4643_v30  ;;  %660 = vmatmul.mubr.bf16.vlgmr.msra.gmra.mrb[12].mxu1 %v4646_v31 }
  0x7f   : > { %3485 = vmatprep.mubr.msk.bf16.mxu0 %vm313_vm0, %v4649_v32  ;;  %3500 = vmatprep.mubr.msk.bf16.mxu1 %vm313_vm0, %v4651_v33 }
  0x80   : > { %4148 = vmatpush3.bf16.msra.mxu1 %v5040_v40  ;;  %4040 = vmatpush3.bf16.msra.mxu0 %v5076_v44 }
  0x81   : > { %4149 = vmatprep.subr.bf16.mxu1 %v5047_v41  ;;  %4041 = vmatprep.subr.bf16.mxu0 %v5101_v11 }
  0x84   : > { %4150 = vmatpush3.bf16.msra.mxu1 %v5047_v41  ;;  %4042 = vmatpush3.bf16.msra.mxu0 %v5101_v11 }
  0x85   : > { %4151 = vmatprep.subr.bf16.mxu1 %v5054_v42  ;;  %4043 = vmatprep.subr.bf16.mxu0 %v5114_v20 }
  0x86   : > { %568 = vmatmul.mubr.bf16.gmra.mrb[16].mxu0 %v4653_v34  ;;  %668 = vmatmul.mubr.bf16.gmra.mrb[16].mxu1 %v4654_v35 }
  0x87   : > { %3486 = vmatprep.mubr.msk.bf16.mxu0 %vm313_vm0, %v4655_v36  ;;  %3501 = vmatprep.mubr.msk.bf16.mxu1 %vm313_vm0, %v4657_v37 }
  0x88   : > { %4152 = vmatpush3.bf16.msra.mxu1 %v5054_v42  ;;  %4044 = vmatpush3.bf16.msra.mxu0 %v5114_v20 }
  0x89   : > { %4153 = vmatprep.subr.bf16.mxu1 %v5069_v43  ;;  %4045 = vmatprep.subr.bf16.mxu0 %v5121_v29 }
  0x8c   : > { %4154 = vmatpush3.bf16.msra.mxu1 %v5069_v43  ;;  %4046 = vmatpush3.bf16.msra.mxu0 %v5121_v29 }
  0x8d   : > { %4159 = vmatprep.subr.bf16.mxu1 %v5106_v12 }
  0x8e   : > { %576 = vmatmul.mubr.bf16.gmra.mrb[20].mxu0 %v4659_v38  ;;  %676 = vmatmul.mubr.bf16.gmra.mrb[20].mxu1 %v4660_v39 }
 0x119   : > { %v361_v45 = vpop.f32.mrb[0].mxu0  ;;  %v461_v46 = vpop.f32.mrb[0].mxu1 }
 0x11a   : > { %v684_v47 = vmax.f32 %v361_v45, %v461_v46  ;;  %v363_v48 = vpop.f32.mrb[1].mxu0  ;;  %v463_v49 = vpop.f32.mrb[1].mxu1 }
 0x11b   : > { %v364_v50 = vpop.f32.mrb[2].mxu0  ;;  %v464_v51 = vpop.f32.mrb[2].mxu1 }
 0x11c   : > { %v685_v52 = vmax.f32 %v364_v50, %v464_v51  ;;  %v366_v53 = vpop.f32.mrb[3].mxu0  ;;  %v466_v54 = vpop.f32.mrb[3].mxu1 }
 0x11d   : > { %v5137_v54 = vld [vmem:[%s5956_s2] sm:$0xff]  }
 0x11e   : > { %4051 = vmatprep.subr.bf16.mxu0 %v5137_v54 }
 0x121   : > { %v369_v55 = vpop.f32.mrb[4].mxu0  ;;  %v469_v56 = vpop.f32.mrb[4].mxu1 }
 0x122   : > { %v686_v57 = vmax.f32 %v369_v55, %v469_v56  ;;  %v371_v58 = vpop.f32.mrb[5].mxu0  ;;  %v471_v59 = vpop.f32.mrb[5].mxu1 }
 0x123   : > { %v5080_v60 = vpop.f32.mrb[6].mxu0  ;;  %v5082_v61 = vpop.f32.mrb[6].mxu1 }
 0x124   : > { %v687_v62 = vmax.f32 %v5080_v60, %v5082_v61  ;;  %v374_v63 = vpop.f32.mrb[7].mxu0  ;;  %v474_v0 = vpop.f32.mrb[7].mxu1 }
 0x129   : > { %v5086_v1 = vpop.f32.mrb[8].mxu0  ;;  %v5088_v2 = vpop.f32.mrb[8].mxu1 }
 0x12a   : > { %v688_v3 = vmax.f32 %v5086_v1, %v5088_v2  ;;  %v379_v4 = vpop.f32.mrb[9].mxu0  ;;  %v479_v5 = vpop.f32.mrb[9].mxu1 }
 0x12b   : > { %v5092_v6 = vpop.f32.mrb[10].mxu0  ;;  %v5094_v7 = vpop.f32.mrb[10].mxu1 }
 0x12c   : > { %v689_v8 = vmax.f32 %v5092_v6, %v5094_v7  ;;  %v382_v9 = vpop.f32.mrb[11].mxu0  ;;  %v482_v10 = vpop.f32.mrb[11].mxu1 }
 0x151   : > { %v561_v13 = vpop.f32.mrb[12].mxu0  ;;  %v661_v14 = vpop.f32.mrb[12].mxu1 }
 0x152   : > { %v690_v15 = vmax.f32 %v561_v13, %v661_v14  ;;  %v563_v16 = vpop.f32.mrb[13].mxu0  ;;  %v663_v17 = vpop.f32.mrb[13].mxu1 }
 0x153   : > { %v564_v18 = vpop.f32.mrb[14].mxu0  ;;  %v664_v19 = vpop.f32.mrb[14].mxu1 }
 0x154   : > { %v696_v21 = vmax.f32 %v684_v47, %v690_v15  ;;  %v691_v22 = vmax.f32 %v564_v18, %v664_v19  ;;  %v566_v23 = vpop.f32.mrb[15].mxu0  ;;  %v666_v24 = vpop.f32.mrb[15].mxu1 }
 0x155   : > { %v815_v23 = vld [vmem:[#allocation2 + $0x2c] sm:$0x7]  ;;  %v5184_v24 = vld [vmem:[%s5956_s2 + $0x130] sm:$0xff]  }
 0x156   : > { %v702_v25 = vmax.f32 %v696_v21, 0.0  ;;  %v697_v26 = vmax.f32 %v685_v52, %v691_v22  ;;  %v5174_v22 = vld [vmem:[%s5956_s2 + $0x128] sm:$0xff]  }
 0x158   : > { %v3809_v27 = vpack.c.bf16 %v702_v25, %v702_v25  ;;  %v703_v28 = vmax.f32 %v697_v26, 0.0 }
 0x159   : > { %v569_v30 = vpop.f32.mrb[16].mxu0  ;;  %v669_v31 = vpop.f32.mrb[16].mxu1 }
 0x15a   : > { %v3810_v32 = vpack.c.bf16 %v703_v28, %v703_v28  ;;  %v692_v33 = vmax.f32 %v569_v30, %v669_v31  ;;  %v571_v34 = vpop.f32.mrb[17].mxu0  ;;  %v671_v35 = vpop.f32.mrb[17].mxu1  ;;  %v740_v36 = vrot.slane %v3809_v27, 5  ;;  %v5197_v31 = vld [vmem:[%s5956_s2 + $0x138] sm:$0xff]  }
 0x15b   : > { %v572_v37 = vpop.f32.mrb[18].mxu0  ;;  %v672_v38 = vpop.f32.mrb[18].mxu1  ;;  %v5210_v35 = vld [vmem:[%s5956_s2 + $0x160] sm:$0xff]  }
 0x15c   : > { %v742_v45 = vrot.slane %v3810_v32, 5  ;;  %v698_v46 = vmax.f32 %v686_v57, %v692_v33  ;;  %v693_v47 = vmax.f32 %v572_v37, %v672_v38  ;;  %v674_v48 = vpop.f32.mrb[19].mxu1  ;;  %757 = vrot.lane.b32.xlu0 %v740_v36, %s4758_s14  ;;  %753 = vst.msk [vmem:[#allocation2] sm:$0x8] %vm752_vm6, %v740_v36  ;;  %v574_v49 = vpop.f32.mrb[19].mxu0  ;;  %v741_v50 = vrot.slane %v740_v36, 4 }
 0x15e   : > { %v704_v51 = vmax.f32 %v698_v46, 0.0  ;;  %v699_v52 = vmax.f32 %v687_v62, %v693_v47  ;;  %v743_v53 = vsel %vm5124_vm7, %v741_v50, %v742_v45  ;;  %v744_v0 = vrot.slane %v742_v45, 4 }
 0x15f   : > { %754 = vst.msk [vmem:[#allocation2 + $0x4] sm:$0xf] %vm711_vm2, %v743_v53 }
 0x160   : > { %v3811_v55 = vpack.c.bf16 %v704_v51, %v704_v51  ;;  %v705_v56 = vmax.f32 %v699_v52, 0.0  ;;  %759 = vrot.lane.b32.xlu0 %v743_v53, %s4758_s14  ;;  %v5233_v53 = vld [vmem:[%s5956_s2 + $0x8] sm:$0xff]  }
 0x161   : > { %v577_v57 = vpop.f32.mrb[20].mxu0  ;;  %v677_v58 = vpop.f32.mrb[20].mxu1 }
 0x162   : > { %v745_v59 = vrot.slane %v3811_v55, 5  ;;  %v3812_v60 = vpack.c.bf16 %v705_v56, %v705_v56  ;;  %v694_v61 = vmax.f32 %v577_v57, %v677_v58  ;;  %v579_v62 = vpop.f32.mrb[21].mxu0  ;;  %v679_v63 = vpop.f32.mrb[21].mxu1  ;;  %v5238_v55 = vld [vmem:[%s5956_s2 + $0x168] sm:$0xff]   ;;  %v5250_v57 = vld [vmem:[%s5956_s2 + $0x10] sm:$0xff]  }
 0x163   : > { %v580_v4 = vpop.f32.mrb[22].mxu0  ;;  %v680_v5 = vpop.f32.mrb[22].mxu1  ;;  %v801_v19 = vld [vmem:[#allocation2] sm:$0xf]  ;;  %v5255_v58 = vld [vmem:[%s5956_s2 + $0x170] sm:$0xff]   ;;  %v5266_v63 = vld [vmem:[%s5956_s2 + $0x18] sm:$0xff]  }
 0x164   : > { %785 = vst.msk [vmem:[#allocation2 + $0x20] sm:$0xf] %vm711_vm2, %v3812_v60  ;;  %v700_v9 = vmax.f32 %v688_v3, %v694_v61  ;;  %v695_v10 = vmax.f32 %v580_v4, %v680_v5  ;;  %v746_v13 = vsel %vm5124_vm7, %v744_v0, %v745_v59  ;;  %v747_v14 = vrot.slane %v745_v59, 4  ;;  %v582_v15 = vpop.f32.mrb[23].mxu0  ;;  %v682_v16 = vpop.f32.mrb[23].mxu1  ;;  %v5271_v0 = vld [vmem:[%s5956_s2 + $0x178] sm:$0xff]  }
 0x165   : > { %761 = vrot.lane.b32.xlu1 %v746_v13, %s4758_s14  ;;  %755 = vst.msk [vmem:[#allocation2 + $0x8] sm:$0xf] %vm711_vm2, %v746_v13  ;;  %v5287_v13 = vld [vmem:[%s5956_s2 + $0x180] sm:$0xff]   ;;  %v5300_v16 = vld [vmem:[%s5956_s2 + $0x48] sm:$0xff]  }
 0x166   : > { %v706_v17 = vmax.f32 %v700_v9, 0.0  ;;  %v701_v18 = vmax.f32 %v689_v8, %v695_v10  ;;  %v5152_v21 = vld [vmem:[#allocation2 + $0x4] sm:$0xf]  ;;  %756 = vst.msk [vmem:[#allocation2 + $0xc] sm:$0x7] %vm715_vm3, %v747_v14 }
 0x167   : > { %v5156_v1 = vcombine.low %v801_v19, %v5152_v21  ;;  %v5282_v10 = vld [vmem:[%s5956_s2 + $0x40] sm:$0xff]   ;;  %v5321_v19 = vld [vmem:[%s5956_s2 + $0x50] sm:$0xff]  }
 0x168   : > { %v3813_v2 = vpack.c.bf16 %v706_v17, %v706_v17  ;;  %v707_v3 = vmax.f32 %v701_v18, 0.0  ;;  %v5305_v17 = vld [vmem:[%s5956_s2 + $0x188] sm:$0xff]  }
 0x169   : > { %4155 = vmatprep.mubr.msk.bf16.mxu1 %vm1014_vm8, %v5156_v1  ;;  %788 = vrot.lane.b32.xlu1 %v3812_v60, %s4758_s14  ;;  %v820_v60 = vld [vmem:[#allocation2 + $0x3c] sm:$0x7] }
 0x16a   : > { %786 = vst.msk [vmem:[#allocation2 + $0x24] sm:$0xf] %vm711_vm2, %v3813_v2  ;;  %v3814_v6 = vpack.c.bf16 %v707_v3, %v707_v3  ;;  %790 = vrot.lane.b32.xlu0 %v3813_v2, %s4758_s14  ;;  %v5328_v2 = vld [vmem:[%s5956_s2 + $0x190] sm:$0xff]   ;;  %v5342_v3 = vld [vmem:[%s5956_s2 + $0x198] sm:$0xff]  }
 0x16b   : > { %v814_v26 = vld [vmem:[#allocation2 + $0x20] sm:$0x8] }
 0x16c   : > { %787 = vst.msk [vmem:[#allocation2 + $0x28] sm:$0xf] %vm711_vm2, %v3814_v6  ;;  %v5164_v7 = vld [vmem:[#allocation2 + $0x8] sm:$0xf] }
 0x16d   : > { %792 = vrot.lane.b32.xlu1 %v3814_v6, %s4758_s14  ;;  %v5169_v8 = vcombine.low %v5164_v7, %v5164_v7  ;;  %v5350_v6 = vld [vmem:[%s5956_s2 + $0x60] sm:$0xff]  }
 0x16e   : > { %763 = vrot.lane.b32.xlu0 %v747_v14, %s4758_s14 }
 0x16f   : > { %4156 = vmatmul.mubr.msk.bf16.vlgmr.msra.gmra.mrb[24].mxu1 %vm1014_vm8, %v5169_v8 }
 0x170   : > { %4160 = vmatpush3.bf16.msra.mxu1 %v5106_v12 }
 0x171   : > { %4161 = vmatprep.subr.bf16.mxu1 %v5174_v22  ;;  %v5186_v25 = vld [vmem:[#allocation2 + $0x24] sm:$0xf] }
 0x172   : > { %v3776_v27 = vcombine.low %v814_v26, %v5186_v25 }
 0x173   : > { %v5189_v28 = vld [vmem:[#allocation2 + $0x28] sm:$0xf] }
 0x174   : > { %4162 = vmatpush3.bf16.msra.mxu1 %v5174_v22  ;;  %v3777_v30 = vcombine.low %v5189_v28, %v815_v23  ;;  %v2714_v32 = vrot.slane %v3776_v27, 3  ;;  %v5356_v23 = vld [vmem:[%s5956_s2 + $0x1a0] sm:$0xff]  }
 0x175   : > { %4163 = vmatprep.subr.bf16.mxu1 %v5184_v24  ;;  %v811_v27 = vld [vmem:[#allocation2 + $0x20] sm:$0xf] }
 0x176   : > { %v5199_v33 = vrot.slane %v3777_v30, 3  ;;  %v5367_v30 = vld [vmem:[%s5956_s2 + $0x68] sm:$0xff]  }
 0x178   : > { %5997 = vst [vmem:[#allocation3_spill] sm:$0xff] %v5199_v33  ;;  %4164 = vmatpush3.bf16.msra.mxu1 %v5184_v24  ;;  %v5204_v34 = vsel %vm1489_vm9, %v2714_v32, %v5199_v33  ;;  %v5372_v32 = vcombine.low %v811_v27, %v5186_v25  ;;  %v5396_v25 = vld [vmem:[%s5956_s2 + $0x1b0] sm:$0xff]   ;;  %v5551_v33 = vld [vmem:[%s5956_s2 + $0x1f8] sm:$0xff]  }
 0x179   : > { %5998 = vst [vmem:[#allocation4_spill] sm:$0xff] %v5204_v34  ;;  %4165 = vmatprep.subr.bf16.mxu1 %v5197_v31 }
 0x17c   : > { %4166 = vmatpush3.bf16.msra.mxu1 %v5197_v31 }
 0x17d   : > { %4171 = vmatprep.subr.bf16.mxu1 %v5210_v35 }
 0x1ce   : > { %v758_v36 = vpop.permute.xlu0 %757 }
 0x1cf   : > { %770 = vst.msk [vmem:[#allocation2 + $0x10] sm:$0x8] %vm752_vm6, %v758_v36  ;;  %v5377_v36 = vld [vmem:[%s5956_s2 + $0x1a8] sm:$0xff]  }
 0x1d2   : > { %v760_v37 = vpop.permute.xlu0 %759 }
 0x1d3   : > { %771 = vst.msk [vmem:[#allocation2 + $0x14] sm:$0xf] %vm711_vm2, %v760_v37  ;;  %v5405_v37 = vld [vmem:[%s5956_s2 + $0x78] sm:$0xff]  }
 0x1d6   : > { %v806_v39 = vld [vmem:[#allocation2 + $0x10] sm:$0xf] }
 0x1d7   : > { %v762_v38 = vpop.permute.xlu1 %761 }
 0x1d8   : > { %772 = vst.msk [vmem:[#allocation2 + $0x18] sm:$0xf] %vm711_vm2, %v762_v38  ;;  %v5411_v38 = vld [vmem:[%s5956_s2 + $0x1b8] sm:$0xff]  }
 0x1da   : > { %v5217_v45 = vld [vmem:[#allocation2 + $0x14] sm:$0xf] }
 0x1db   : > { %v789_v46 = vpop.permute.xlu1 %788  ;;  %v3644_v47 = vcombine.low %v806_v39, %v5217_v45  ;;  %v5419_v39 = vld [vmem:[%s5956_s2 + $0x80] sm:$0xff]  }
 0x1dc   : > { %798 = vst.msk [vmem:[#allocation2 + $0x30] sm:$0xf] %vm711_vm2, %v789_v46  ;;  %v791_v48 = vpop.permute.xlu0 %790  ;;  %v5425_v46 = vld [vmem:[%s5956_s2 + $0x1c0] sm:$0xff]  }
 0x1dd   : > { %799 = vst.msk [vmem:[#allocation2 + $0x34] sm:$0xf] %vm711_vm2, %v791_v48  ;;  %4047 = vmatprep.mubr.msk.bf16.mxu0 %vm1014_vm8, %v3644_v47  ;;  %4167 = vmatprep.mubr.msk.bf16.mxu1 %vm1014_vm8, %v3644_v47  ;;  %v5438_v48 = vld [vmem:[%s5956_s2 + $0x88] sm:$0xff]  }
 0x1df   : > { %v793_v49 = vpop.permute.xlu1 %792  ;;  %v5224_v50 = vld [vmem:[#allocation2 + $0x18] sm:$0xf] }
 0x1e0   : > { %800 = vst.msk [vmem:[#allocation2 + $0x38] sm:$0xf] %vm711_vm2, %v793_v49  ;;  %v764_v51 = vpop.permute.xlu0 %763  ;;  %v3645_v52 = vcombine.low %v5224_v50, %v5224_v50  ;;  %v5445_v49 = vld [vmem:[%s5956_s2 + $0x1c8] sm:$0xff]  }
 0x1e1   : > { %773 = vst.msk [vmem:[#allocation2 + $0x1c] sm:$0x7] %vm715_vm3, %v764_v51  ;;  %v5464_v51 = vld [vmem:[%s5956_s2 + $0x1d0] sm:$0xff]  }
 0x1e2   : > { %4048 = vmatmul.mubr.msk.bf16.vlgmr.msra.gmra.mrb[24].mxu0 %vm1014_vm8, %v3645_v52  ;;  %4168 = vmatmul.mubr.msk.bf16.vlgmr.msra.gmra.mrb[24].mxu1 %vm1014_vm8, %v3645_v52 }
 0x1e3   : > { %4052 = vmatpush3.bf16.msra.mxu0 %v5137_v54  ;;  %4172 = vmatpush3.bf16.msra.mxu1 %v5210_v35  ;;  %v819_v56 = vld [vmem:[#allocation2 + $0x30] sm:$0x8] }
 0x1e4   : > { %4059 = vmatprep.mubr.msk.bf16.mxu0 %vm1014_vm8, %v5156_v1  ;;  %4179 = vmatprep.mubr.msk.bf16.mxu1 %vm1014_vm8, %v3644_v47  ;;  %v817_v59 = vld [vmem:[#allocation2 + $0x34] sm:$0xf]  ;;  %v816_v15 = vld [vmem:[#allocation2 + $0x30] sm:$0xf]  ;;  %v5431_v47 = vcombine.low %v5189_v28, %v5189_v28 }
 0x1e5   : > { %4053 = vmatprep.subr.bf16.mxu0 %v5233_v53  ;;  %4173 = vmatprep.subr.bf16.mxu1 %v5238_v55  ;;  %v3780_v61 = vcombine.low %v819_v56, %v817_v59  ;;  %v5310_v18 = vcombine.low %v816_v15, %v817_v59  ;;  %v5456_v28 = vld [vmem:[%s5956_s2 + $0x90] sm:$0xff]   ;;  %v5479_v59 = vld [vmem:[%s5956_s2 + $0x1d8] sm:$0xff]   ;;  %v5506_v15 = vld [vmem:[%s5956_s2 + $0xa8] sm:$0xff]  }
 0x1e6   : > { %6000 = vst [vmem:[#allocation6_spill] sm:$0xff] %v5506_v15 }
 0x1e7   : > { %4054 = vmatpush3.bf16.msra.mxu0 %v5233_v53  ;;  %4174 = vmatpush3.bf16.msra.mxu1 %v5238_v55  ;;  %v818_v62 = vld [vmem:[#allocation2 + $0x38] sm:$0xf]  ;;  %v2780_v5 = vrot.slane %v3780_v61, 3  ;;  %v5488_v61 = vld [vmem:[%s5956_s2 + $0xa0] sm:$0xff]  }
 0x1e8   : > { %4055 = vmatprep.subr.bf16.mxu0 %v5250_v57  ;;  %4175 = vmatprep.subr.bf16.mxu1 %v5255_v58  ;;  %v3781_v4 = vcombine.low %v818_v62, %v820_v60  ;;  %v5361_v26 = vcombine.low %v818_v62, %v818_v62  ;;  %v810_v56 = vld [vmem:[#allocation2 + $0x1c] sm:$0x7]  ;;  %v809_v62 = vld [vmem:[#allocation2 + $0x10] sm:$0x8] }
 0x1e9   : > { %v3697_v60 = vcombine.low %v5224_v50, %v810_v56 }
 0x1ea   : > { %v5273_v9 = vrot.slane %v3781_v4, 3  ;;  %v5494_v4 = vld [vmem:[%s5956_s2 + $0x1e0] sm:$0xff]  }
 0x1eb   : > { %4056 = vmatpush3.bf16.msra.mxu0 %v5250_v57  ;;  %4176 = vmatpush3.bf16.msra.mxu1 %v5255_v58  ;;  %v5498_v50 = vrot.slane %v3697_v60, 3  ;;  %v5528_v60 = vld [vmem:[%s5956_s2 + $0xb0] sm:$0xff]  }
 0x1ec   : > { %5999 = vst [vmem:[#allocation5_spill] sm:$0xff] %v5273_v9  ;;  %4057 = vmatprep.subr.bf16.mxu0 %v5266_v63  ;;  %4177 = vmatprep.subr.bf16.mxu1 %v5271_v0  ;;  %v5291_v14 = vsel %vm1489_vm9, %v2780_v5, %v5273_v9  ;;  %v3696_v5 = vcombine.low %v809_v62, %v5217_v45  ;;  %v5513_v45 = vld [vmem:[%s5956_s2 + $0x1e8] sm:$0xff]   ;;  %v5536_v62 = vld [vmem:[%s5956_s2 + $0x1f0] sm:$0xff]   ;;  %v804_v9 = vld [vmem:[#allocation2] sm:$0x8] }
 0x1ed   : > { %6001 = vst [vmem:[#allocation7_spill] sm:$0xff] %v5513_v45  ;;  %6002 = vst [vmem:[#allocation8_spill] sm:$0xff] %v5536_v62 }
 0x1ee   : > { %v1580_v27 = vrot.slane %v3696_v5, 3  ;;  %v805_v5 = vld [vmem:[#allocation2 + $0xc] sm:$0x7] }
 0x1ef   : > { %4058 = vmatpush3.bf16.msra.mxu0 %v5266_v63  ;;  %4178 = vmatpush3.bf16.msra.mxu1 %v5271_v0  ;;  %v3689_v34 = vcombine.low %v5164_v7, %v805_v5  ;;  %v5567_v7 = vld [vmem:[%s5956_s2 + $0x200] sm:$0xff]  }
 0x1f0   : > { %4063 = vmatprep.subr.bf16.mxu0 %v5282_v10  ;;  %4183 = vmatprep.subr.bf16.mxu1 %v5287_v13  ;;  %v5523_v56 = vsel %vm1489_vm9, %v1580_v27, %v5498_v50  ;;  %v5545_v27 = vld [vmem:[%s5956_s2 + $0xb8] sm:$0xff]   ;;  %6004 = vst [vmem:[#allocation10_spill] sm:$0xff] %v5567_v7 }
 0x1f1   : > { %v5569_v5 = vrot.slane %v3689_v34, 3  ;;  %v5585_v34 = vld [vmem:[%s5956_s2 + $0x208] sm:$0xff]  }
 0x1f2   : > { %4060 = vmatmul.mubr.msk.bf16.vlgmr.msra.gmra.mrb[24].mxu0 %vm1014_vm8, %v5169_v8  ;;  %4180 = vmatmul.mubr.msk.bf16.vlgmr.msra.gmra.mrb[24].mxu1 %vm1014_vm8, %v3645_v52  ;;  %v5473_v52 = vld [vmem:[%s5956_s2 + $0x98] sm:$0xff]   ;;  %6006 = vst [vmem:[#allocation12_spill] sm:$0xff] %v5585_v34 }
 0x1f3   : > { %4064 = vmatpush3.bf16.msra.mxu0 %v5282_v10  ;;  %4071 = vmatprep.mubr.msk.bf16.mxu0 %vm1014_vm8, %v5156_v1  ;;  %v5336_v1 = vld [vmem:[%s5956_s2 + $0x58] sm:$0xff]  }
 0x1f4   : > { %4184 = vmatpush3.bf16.msra.mxu1 %v5287_v13  ;;  %4191 = vmatprep.mubr.msk.bf16.mxu1 %vm1014_vm8, %v5310_v18 }
 0x1f5   : > { %4065 = vmatprep.subr.bf16.mxu0 %v5300_v16  ;;  %4185 = vmatprep.subr.bf16.mxu1 %v5305_v17 }
 0x1f7   : > { %4066 = vmatpush3.bf16.msra.mxu0 %v5300_v16 }
 0x1f8   : > { %4186 = vmatpush3.bf16.msra.mxu1 %v5305_v17  ;;  %4067 = vmatprep.subr.bf16.mxu0 %v5321_v19 }
 0x1f9   : > { %4187 = vmatprep.subr.bf16.mxu1 %v5328_v2 }
 0x1fb   : > { %4068 = vmatpush3.bf16.msra.mxu0 %v5321_v19 }
 0x1fc   : > { %4188 = vmatpush3.bf16.msra.mxu1 %v5328_v2  ;;  %4069 = vmatprep.subr.bf16.mxu0 %v5336_v1 }
 0x1fd   : > { %4189 = vmatprep.subr.bf16.mxu1 %v5342_v3 }
 0x1ff   : > { %4070 = vmatpush3.bf16.msra.mxu0 %v5336_v1 }
 0x200   : > { %4190 = vmatpush3.bf16.msra.mxu1 %v5342_v3  ;;  %4075 = vmatprep.subr.bf16.mxu0 %v5350_v6 }
 0x201   : > { %4195 = vmatprep.subr.bf16.mxu1 %v5356_v23 }
 0x202   : > { %4072 = vmatmul.mubr.msk.bf16.vlgmr.msra.gmra.mrb[24].mxu0 %vm1014_vm8, %v5169_v8  ;;  %v5388_v8 = vld [vmem:[%s5956_s2 + $0x70] sm:$0xff]  }
 0x203   : > { %4192 = vmatmul.mubr.msk.bf16.vlgmr.msra.gmra.mrb[24].mxu1 %vm1014_vm8, %v5361_v26  ;;  %4076 = vmatpush3.bf16.msra.mxu0 %v5350_v6 }
 0x204   : > { %4083 = vmatprep.mubr.msk.bf16.mxu0 %vm1014_vm8, %v5372_v32  ;;  %4196 = vmatpush3.bf16.msra.mxu1 %v5356_v23 }
 0x205   : > { %4203 = vmatprep.mubr.msk.bf16.mxu1 %vm1014_vm8, %v5372_v32  ;;  %4077 = vmatprep.subr.bf16.mxu0 %v5367_v30 }
 0x206   : > { %4197 = vmatprep.subr.bf16.mxu1 %v5377_v36 }
 0x207   : > { %4078 = vmatpush3.bf16.msra.mxu0 %v5367_v30 }
 0x208   : > { %4198 = vmatpush3.bf16.msra.mxu1 %v5377_v36  ;;  %4079 = vmatprep.subr.bf16.mxu0 %v5388_v8 }
 0x209   : > { %4199 = vmatprep.subr.bf16.mxu1 %v5396_v25 }
 0x20b   : > { %4080 = vmatpush3.bf16.msra.mxu0 %v5388_v8 }
 0x20c   : > { %4200 = vmatpush3.bf16.msra.mxu1 %v5396_v25  ;;  %4081 = vmatprep.subr.bf16.mxu0 %v5405_v37 }
 0x20d   : > { %4201 = vmatprep.subr.bf16.mxu1 %v5411_v38 }
 0x20f   : > { %4082 = vmatpush3.bf16.msra.mxu0 %v5405_v37 }
 0x210   : > { %4202 = vmatpush3.bf16.msra.mxu1 %v5411_v38  ;;  %4087 = vmatprep.subr.bf16.mxu0 %v5419_v39 }
 0x211   : > { %4207 = vmatprep.subr.bf16.mxu1 %v5425_v46 }
 0x212   : > { %4084 = vmatmul.mubr.msk.bf16.vlgmr.msra.gmra.mrb[24].mxu0 %vm1014_vm8, %v5431_v47 }
 0x213   : > { %4204 = vmatmul.mubr.msk.bf16.vlgmr.msra.gmra.mrb[24].mxu1 %vm1014_vm8, %v5431_v47  ;;  %4088 = vmatpush3.bf16.msra.mxu0 %v5419_v39 }
 0x214   : > { %4095 = vmatprep.mubr.msk.bf16.mxu0 %vm1014_vm8, %v5310_v18  ;;  %4208 = vmatpush3.bf16.msra.mxu1 %v5425_v46 }
 0x215   : > { %4215 = vmatprep.mubr.msk.bf16.mxu1 %vm1014_vm8, %v5310_v18  ;;  %4089 = vmatprep.subr.bf16.mxu0 %v5438_v48 }
 0x216   : > { %4209 = vmatprep.subr.bf16.mxu1 %v5445_v49 }
 0x217   : > { %4090 = vmatpush3.bf16.msra.mxu0 %v5438_v48 }
 0x218   : > { %4210 = vmatpush3.bf16.msra.mxu1 %v5445_v49  ;;  %4091 = vmatprep.subr.bf16.mxu0 %v5456_v28 }
 0x219   : > { %4211 = vmatprep.subr.bf16.mxu1 %v5464_v51 }
 0x21b   : > { %4092 = vmatpush3.bf16.msra.mxu0 %v5456_v28 }
 0x21c   : > { %4212 = vmatpush3.bf16.msra.mxu1 %v5464_v51  ;;  %4093 = vmatprep.subr.bf16.mxu0 %v5473_v52 }
 0x21d   : > { %4213 = vmatprep.subr.bf16.mxu1 %v5479_v59 }
 0x21f   : > { %4094 = vmatpush3.bf16.msra.mxu0 %v5473_v52 }
 0x220   : > { %4214 = vmatpush3.bf16.msra.mxu1 %v5479_v59  ;;  %4099 = vmatprep.subr.bf16.mxu0 %v5488_v61 }
 0x221   : > { %4219 = vmatprep.subr.bf16.mxu1 %v5494_v4 }
 0x222   : > { %4096 = vmatmul.mubr.msk.bf16.vlgmr.msra.gmra.mrb[24].mxu0 %vm1014_vm8, %v5361_v26 }
 0x223   : > { %4216 = vmatmul.mubr.msk.bf16.vlgmr.msra.gmra.mrb[24].mxu1 %vm1014_vm8, %v5361_v26  ;;  %4100 = vmatpush3.bf16.msra.mxu0 %v5488_v61 }
 0x224   : > { %4107 = vmatprep.mubr.msk.bf16.mxu0 %vm1014_vm8, %v5372_v32  ;;  %4220 = vmatpush3.bf16.msra.mxu1 %v5494_v4 }
 0x225   : > { %4227 = vmatprep.mubr.msk.bf16.mxu1 %vm1014_vm8, %v5523_v56  ;;  %4101 = vmatprep.subr.bf16.mxu0 %v5506_v15 }
 0x226   : > { %4221 = vmatprep.subr.bf16.mxu1 %v5513_v45 }
 0x227   : > { %4102 = vmatpush3.bf16.msra.mxu0 %v5506_v15  ;;  %v3688_v15 = vcombine.low %v804_v9, %v5152_v21  ;;  %v5578_v21 = vld [vmem:[%s5956_s2 + $0xc8] sm:$0xff]  }
 0x228   : > { %4222 = vmatpush3.bf16.msra.mxu1 %v5513_v45  ;;  %4103 = vmatprep.subr.bf16.mxu0 %v5528_v60  ;;  %v5560_v45 = vld [vmem:[%s5956_s2 + $0xc0] sm:$0xff]   ;;  %6005 = vst [vmem:[#allocation11_spill] sm:$0xff] %v5578_v21 }
 0x229   : > { %4223 = vmatprep.subr.bf16.mxu1 %v5536_v62  ;;  %6003 = vst [vmem:[#allocation9_spill] sm:$0xff] %v5560_v45 }
 0x22b   : > { %4104 = vmatpush3.bf16.msra.mxu0 %v5528_v60 }
 0x22c   : > { %4224 = vmatpush3.bf16.msra.mxu1 %v5536_v62  ;;  %4105 = vmatprep.subr.bf16.mxu0 %v5545_v27  ;;  %v1490_v62 = vrot.slane %v3688_v15, 3  ;;  %v5600_v15 = vld [vmem:[%s5956_s2 + $0xd0] sm:$0xff]  }
 0x22d   : > { %4225 = vmatprep.subr.bf16.mxu1 %v5551_v33  ;;  %6007 = vst [vmem:[#allocation13_spill] sm:$0xff] %v5600_v15 }
 0x22e   : > { %v5592_v9 = vsel %vm1489_vm9, %v1490_v62, %v5569_v5  ;;  %v5608_v62 = vld [vmem:[%s5956_s2 + $0x210] sm:$0xff]  }
 0x22f   : > { %4106 = vmatpush3.bf16.msra.mxu0 %v5545_v27  ;;  %6008 = vst [vmem:[#allocation14_spill] sm:$0xff] %v5608_v62 }
 0x230   : > { %4226 = vmatpush3.bf16.msra.mxu1 %v5551_v33  ;;  %4111 = vmatprep.subr.bf16.mxu0 %v5560_v45 }
 0x231   : > { %4231 = vmatprep.subr.bf16.mxu1 %v5567_v7 }
 0x232   : > { %4108 = vmatmul.mubr.msk.bf16.vlgmr.msra.gmra.mrb[24].mxu0 %vm1014_vm8, %v5431_v47 }
 0x233   : > { %4228 = vmatmul.mubr.msk.bf16.vlgmr.msra.gmra.mrb[24].mxu1 %vm1014_vm8, %v5498_v50  ;;  %4112 = vmatpush3.bf16.msra.mxu0 %v5560_v45  ;;  %v5623_v45 = vld [vmem:[%s5956_s2 + $0x218] sm:$0xff]  }
 0x234   : > { %4119 = vmatprep.mubr.msk.bf16.mxu0 %vm1014_vm8, %v5592_v9  ;;  %4232 = vmatpush3.bf16.msra.mxu1 %v5567_v7  ;;  %v5617_v7 = vld [vmem:[%s5956_s2 + $0xd8] sm:$0xff]   ;;  %6010 = vst [vmem:[#allocation16_spill] sm:$0xff] %v5623_v45 }
 0x235   : > { %4239 = vmatprep.mubr.msk.bf16.mxu1 %vm1014_vm8, %v5592_v9  ;;  %4113 = vmatprep.subr.bf16.mxu0 %v5578_v21  ;;  %6009 = vst [vmem:[#allocation15_spill] sm:$0xff] %v5617_v7 }
 0x236   : > { %4233 = vmatprep.subr.bf16.mxu1 %v5585_v34 }
 0x237   : > { %4114 = vmatpush3.bf16.msra.mxu0 %v5578_v21  ;;  %v5637_v21 = vld [vmem:[%s5956_s2 + $0x220] sm:$0xff]  }
 0x238   : > { %4234 = vmatpush3.bf16.msra.mxu1 %v5585_v34  ;;  %4115 = vmatprep.subr.bf16.mxu0 %v5600_v15  ;;  %v5631_v34 = vld [vmem:[%s5956_s2 + $0xe0] sm:$0xff]   ;;  %6012 = vst [vmem:[#allocation18_spill] sm:$0xff] %v5637_v21 }
 0x239   : > { %4235 = vmatprep.subr.bf16.mxu1 %v5608_v62  ;;  %6011 = vst [vmem:[#allocation17_spill] sm:$0xff] %v5631_v34 }
 0x23b   : > { %4116 = vmatpush3.bf16.msra.mxu0 %v5600_v15  ;;  %v5653_v15 = vld [vmem:[%s5956_s2 + $0x228] sm:$0xff]  }
 0x23c   : > { %4236 = vmatpush3.bf16.msra.mxu1 %v5608_v62  ;;  %4117 = vmatprep.subr.bf16.mxu0 %v5617_v7  ;;  %v5646_v62 = vld [vmem:[%s5956_s2 + $0xe8] sm:$0xff]   ;;  %6013 = vst [vmem:[#allocation19_spill] sm:$0xff] %v5653_v15 }
 0x23d   : > { %4237 = vmatprep.subr.bf16.mxu1 %v5623_v45 }
 0x23f   : > { %4118 = vmatpush3.bf16.msra.mxu0 %v5617_v7  ;;  %v5672_v7 = vld [vmem:[%s5956_s2 + $0x230] sm:$0xff]  }
 0x240   : > { %4238 = vmatpush3.bf16.msra.mxu1 %v5623_v45  ;;  %4123 = vmatprep.subr.bf16.mxu0 %v5631_v34  ;;  %v5664_v45 = vld [vmem:[%s5956_s2 + $0xf0] sm:$0xff]   ;;  %6014 = vst [vmem:[#allocation20_spill] sm:$0xff] %v5672_v7 }
 0x241   : > { %4243 = vmatprep.subr.bf16.mxu1 %v5637_v21 }
 0x242   : > { %4120 = vmatmul.mubr.msk.bf16.vlgmr.msra.gmra.mrb[24].mxu0 %vm1014_vm8, %v5569_v5 }
 0x243   : > { %4240 = vmatmul.mubr.msk.bf16.vlgmr.msra.gmra.mrb[24].mxu1 %vm1014_vm8, %v5569_v5  ;;  %4124 = vmatpush3.bf16.msra.mxu0 %v5631_v34  ;;  %v5687_v34 = vld [vmem:[%s5956_s2 + $0x238] sm:$0xff]  }
 0x244   : > { %4131 = vmatprep.mubr.msk.bf16.mxu0 %vm1014_vm8, %v5523_v56  ;;  %4244 = vmatpush3.bf16.msra.mxu1 %v5637_v21  ;;  %v5681_v21 = vld [vmem:[%s5956_s2 + $0xf8] sm:$0xff]   ;;  %6015 = vst [vmem:[#allocation21_spill] sm:$0xff] %v5687_v34 }
 0x245   : > { %4251 = vmatprep.mubr.msk.bf16.mxu1 %vm1014_vm8, %v5523_v56  ;;  %4125 = vmatprep.subr.bf16.mxu0 %v5646_v62 }
 0x246   : > { %4245 = vmatprep.subr.bf16.mxu1 %v5653_v15 }
 0x247   : > { %4126 = vmatpush3.bf16.msra.mxu0 %v5646_v62 }
 0x248   : > { %4246 = vmatpush3.bf16.msra.mxu1 %v5653_v15  ;;  %4127 = vmatprep.subr.bf16.mxu0 %v5664_v45  ;;  %v5695_v15 = vld [vmem:[%s5956_s2 + $0x100] sm:$0xff]  }
 0x249   : > { %4247 = vmatprep.subr.bf16.mxu1 %v5672_v7 }
 0x24b   : > { %4128 = vmatpush3.bf16.msra.mxu0 %v5664_v45 }
 0x24c   : > { %4248 = vmatpush3.bf16.msra.mxu1 %v5672_v7  ;;  %4129 = vmatprep.subr.bf16.mxu0 %v5681_v21  ;;  %v5705_v7 = vld [vmem:[%s5956_s2 + $0x108] sm:$0xff]  }
 0x24d   : > { %4249 = vmatprep.subr.bf16.mxu1 %v5687_v34 }
 0x24f   : > { %4130 = vmatpush3.bf16.msra.mxu0 %v5681_v21 }
 0x250   : > { %4250 = vmatpush3.bf16.msra.mxu1 %v5687_v34  ;;  %4135 = vmatprep.subr.bf16.mxu0 %v5695_v15  ;;  %v5718_v34 = vld [vmem:[%s5956_s2 + $0x110] sm:$0xff]  }
 0x251   : > { %4363 = vmatprep.subr.bf16.mxu1 %v5040_v40 }
 0x252   : > { %4132 = vmatmul.mubr.msk.bf16.vlgmr.msra.gmra.mrb[24].mxu0 %vm1014_vm8, %v5498_v50 }
 0x253   : > { %4252 = vmatmul.mubr.msk.bf16.vlgmr.msra.gmra.mrb[24].mxu1 %vm1014_vm8, %v5498_v50  ;;  %4136 = vmatpush3.bf16.msra.mxu0 %v5695_v15 }
 0x254   : > { %4143 = vmatprep.mubr.msk.bf16.mxu0 %vm1014_vm8, %v5592_v9  ;;  %4364 = vmatpush3.bf16.msra.mxu1 %v5040_v40  ;;  %v5730_v40 = vld [vmem:[%s5956_s2 + $0x118] sm:$0xff]  }
 0x255   : > { %4371 = vmatprep.mubr.msk.bf16.mxu1 %vm1014_vm8, %v5372_v32  ;;  %4137 = vmatprep.subr.bf16.mxu0 %v5705_v7 }
 0x256   : > { %4365 = vmatprep.subr.bf16.mxu1 %v5047_v41 }
 0x257   : > { %4138 = vmatpush3.bf16.msra.mxu0 %v5705_v7 }
 0x258   : > { %4366 = vmatpush3.bf16.msra.mxu1 %v5047_v41  ;;  %4139 = vmatprep.subr.bf16.mxu0 %v5718_v34  ;;  %v6016_v41 = vld [vmem:[#allocation6_spill] sm:$0xff] }
 0x259   : > { %4367 = vmatprep.subr.bf16.mxu1 %v5054_v42 }
 0x25b   : > { %4140 = vmatpush3.bf16.msra.mxu0 %v5718_v34 }
 0x25c   : > { %4368 = vmatpush3.bf16.msra.mxu1 %v5054_v42  ;;  %4141 = vmatprep.subr.bf16.mxu0 %v5730_v40  ;;  %v6017_v42 = vld [vmem:[#allocation7_spill] sm:$0xff] }
 0x25d   : > { %4369 = vmatprep.subr.bf16.mxu1 %v5069_v43 }
 0x25f   : > { %4142 = vmatpush3.bf16.msra.mxu0 %v5730_v40 }
 0x260   : > { %4370 = vmatpush3.bf16.msra.mxu1 %v5069_v43  ;;  %4255 = vmatprep.subr.bf16.mxu0 %v5076_v44  ;;  %v6018_v43 = vld [vmem:[#allocation8_spill] sm:$0xff] }
 0x261   : > { %4375 = vmatprep.subr.bf16.mxu1 %v5106_v12 }
 0x262   : > { %4144 = vmatmul.mubr.msk.bf16.vlgmr.msra.gmra.mrb[24].mxu0 %vm1014_vm8, %v5569_v5 }
 0x263   : > { %4372 = vmatmul.mubr.msk.bf16.vlgmr.msra.gmra.mrb[28].mxu1 %vm1014_vm8, %v5431_v47  ;;  %4256 = vmatpush3.bf16.msra.mxu0 %v5076_v44  ;;  %v6019_v44 = vld [vmem:[#allocation9_spill] sm:$0xff] }
 0x264   : > { %4263 = vmatprep.mubr.msk.bf16.mxu0 %vm1014_vm8, %v5310_v18  ;;  %4376 = vmatpush3.bf16.msra.mxu1 %v5106_v12  ;;  %v6021_v12 = vld [vmem:[#allocation5_spill] sm:$0xff] }
 0x265   : > { %4383 = vmatprep.mubr.msk.bf16.mxu1 %vm1014_vm8, %v5310_v18  ;;  %4257 = vmatprep.subr.bf16.mxu0 %v5101_v11 }
 0x266   : > { %4377 = vmatprep.subr.bf16.mxu1 %v5174_v22 }
 0x267   : > { %4258 = vmatpush3.bf16.msra.mxu0 %v5101_v11  ;;  %v6020_v11 = vld [vmem:[#allocation10_spill] sm:$0xff] }
 0x268   : > { %4378 = vmatpush3.bf16.msra.mxu1 %v5174_v22  ;;  %4259 = vmatprep.subr.bf16.mxu0 %v5114_v20  ;;  %v6025_v22 = vld [vmem:[#allocation13_spill] sm:$0xff] }
 0x269   : > { %4379 = vmatprep.subr.bf16.mxu1 %v5184_v24 }
 0x26b   : > { %4260 = vmatpush3.bf16.msra.mxu0 %v5114_v20  ;;  %v6022_v20 = vld [vmem:[#allocation4_spill] sm:$0xff] }
 0x26c   : > { %4380 = vmatpush3.bf16.msra.mxu1 %v5184_v24  ;;  %4261 = vmatprep.subr.bf16.mxu0 %v5121_v29  ;;  %v6026_v24 = vld [vmem:[#allocation14_spill] sm:$0xff] }
 0x26d   : > { %4381 = vmatprep.subr.bf16.mxu1 %v5197_v31 }
 0x26f   : > { %4262 = vmatpush3.bf16.msra.mxu0 %v5121_v29  ;;  %v6023_v29 = vld [vmem:[#allocation11_spill] sm:$0xff] }
 0x270   : > { %4382 = vmatpush3.bf16.msra.mxu1 %v5197_v31  ;;  %4267 = vmatprep.subr.bf16.mxu0 %v5137_v54  ;;  %v6027_v31 = vld [vmem:[#allocation15_spill] sm:$0xff] }
 0x271   : > { %4387 = vmatprep.subr.bf16.mxu1 %v5210_v35 }
 0x272   : > { %4264 = vmatmul.mubr.msk.bf16.vlgmr.msra.gmra.mrb[28].mxu0 %vm1014_vm8, %v5361_v26 }
 0x273   : > { %4384 = vmatmul.mubr.msk.bf16.vlgmr.msra.gmra.mrb[28].mxu1 %vm1014_vm8, %v5361_v26  ;;  %4268 = vmatpush3.bf16.msra.mxu0 %v5137_v54  ;;  %v6024_v54 = vld [vmem:[#allocation12_spill] sm:$0xff] }
 0x274   : > { %4275 = vmatprep.mubr.msk.bf16.mxu0 %vm1014_vm8, %v5372_v32  ;;  %4388 = vmatpush3.bf16.msra.mxu1 %v5210_v35  ;;  %v6029_v35 = vld [vmem:[#allocation17_spill] sm:$0xff] }
 0x275   : > { %4395 = vmatprep.mubr.msk.bf16.mxu1 %vm1014_vm8, %v5310_v18  ;;  %4269 = vmatprep.subr.bf16.mxu0 %v5233_v53 }
 0x276   : > { %4389 = vmatprep.subr.bf16.mxu1 %v5238_v55 }
 0x277   : > { %4270 = vmatpush3.bf16.msra.mxu0 %v5233_v53  ;;  %v6030_v53 = vld [vmem:[#allocation18_spill] sm:$0xff] }
 0x278   : > { %4390 = vmatpush3.bf16.msra.mxu1 %v5238_v55  ;;  %4271 = vmatprep.subr.bf16.mxu0 %v5250_v57  ;;  %v6031_v55 = vld [vmem:[#allocation3_spill] sm:$0xff] }
 0x279   : > { %4391 = vmatprep.subr.bf16.mxu1 %v5255_v58 }
 0x27b   : > { %4272 = vmatpush3.bf16.msra.mxu0 %v5250_v57  ;;  %v6032_v57 = vld [vmem:[#allocation19_spill] sm:$0xff] }
 0x27c   : > { %4392 = vmatpush3.bf16.msra.mxu1 %v5255_v58  ;;  %4273 = vmatprep.subr.bf16.mxu0 %v5266_v63  ;;  %v6033_v58 = vld [vmem:[#allocation20_spill] sm:$0xff] }
 0x27d   : > { %4393 = vmatprep.subr.bf16.mxu1 %v5271_v0 }
 0x27f   : > { %4274 = vmatpush3.bf16.msra.mxu0 %v5266_v63  ;;  %v6034_v63 = vld [vmem:[#allocation21_spill] sm:$0xff] }
 0x280   : > { %4394 = vmatpush3.bf16.msra.mxu1 %v5271_v0  ;;  %4279 = vmatprep.subr.bf16.mxu0 %v5282_v10 }
 0x281   : > { %4399 = vmatprep.subr.bf16.mxu1 %v5287_v13 }
 0x282   : > { %4276 = vmatmul.mubr.msk.bf16.vlgmr.msra.gmra.mrb[28].mxu0 %vm1014_vm8, %v5431_v47 }
 0x283   : > { %4396 = vmatmul.mubr.msk.bf16.vlgmr.msra.gmra.mrb[28].mxu1 %vm1014_vm8, %v5361_v26  ;;  %4280 = vmatpush3.bf16.msra.mxu0 %v5282_v10 }
 0x284   : > { %4287 = vmatprep.mubr.msk.bf16.mxu0 %vm1014_vm8, %v5372_v32  ;;  %4400 = vmatpush3.bf16.msra.mxu1 %v5287_v13 }
 0x285   : > { %4407 = vmatprep.mubr.msk.bf16.mxu1 %vm1014_vm8, %v5523_v56  ;;  %4281 = vmatprep.subr.bf16.mxu0 %v5300_v16 }
 0x286   : > { %4401 = vmatprep.subr.bf16.mxu1 %v5305_v17 }
 0x287   : > { %4282 = vmatpush3.bf16.msra.mxu0 %v5300_v16 }
 0x288   : > { %4402 = vmatpush3.bf16.msra.mxu1 %v5305_v17  ;;  %4283 = vmatprep.subr.bf16.mxu0 %v5321_v19 }
 0x289   : > { %4403 = vmatprep.subr.bf16.mxu1 %v5328_v2 }
 0x28b   : > { %4284 = vmatpush3.bf16.msra.mxu0 %v5321_v19 }
 0x28c   : > { %4404 = vmatpush3.bf16.msra.mxu1 %v5328_v2  ;;  %4285 = vmatprep.subr.bf16.mxu0 %v5336_v1 }
 0x28d   : > { %4405 = vmatprep.subr.bf16.mxu1 %v5342_v3 }
 0x28f   : > { %4286 = vmatpush3.bf16.msra.mxu0 %v5336_v1 }
 0x290   : > { %4406 = vmatpush3.bf16.msra.mxu1 %v5342_v3  ;;  %4291 = vmatprep.subr.bf16.mxu0 %v5350_v6 }
 0x291   : > { %4411 = vmatprep.subr.bf16.mxu1 %v5356_v23 }
 0x292   : > { %4288 = vmatmul.mubr.msk.bf16.vlgmr.msra.gmra.mrb[28].mxu0 %vm1014_vm8, %v5431_v47 }
 0x293   : > { %4408 = vmatmul.mubr.msk.bf16.vlgmr.msra.gmra.mrb[28].mxu1 %vm1014_vm8, %v5498_v50  ;;  %4292 = vmatpush3.bf16.msra.mxu0 %v5350_v6 }
 0x294   : > { %4299 = vmatprep.mubr.msk.bf16.mxu0 %vm1014_vm8, %v5592_v9  ;;  %4412 = vmatpush3.bf16.msra.mxu1 %v5356_v23 }
 0x295   : > { %4419 = vmatprep.mubr.msk.bf16.mxu1 %vm1014_vm8, %v5592_v9  ;;  %4293 = vmatprep.subr.bf16.mxu0 %v5367_v30 }
 0x296   : > { %4413 = vmatprep.subr.bf16.mxu1 %v5377_v36 }
 0x297   : > { %4294 = vmatpush3.bf16.msra.mxu0 %v5367_v30 }
 0x298   : > { %4414 = vmatpush3.bf16.msra.mxu1 %v5377_v36  ;;  %4295 = vmatprep.subr.bf16.mxu0 %v5388_v8 }
 0x299   : > { %4415 = vmatprep.subr.bf16.mxu1 %v5396_v25 }
 0x29b   : > { %4296 = vmatpush3.bf16.msra.mxu0 %v5388_v8 }
 0x29c   : > { %4416 = vmatpush3.bf16.msra.mxu1 %v5396_v25  ;;  %4297 = vmatprep.subr.bf16.mxu0 %v5405_v37 }
 0x29d   : > { %4417 = vmatprep.subr.bf16.mxu1 %v5411_v38 }
 0x29f   : > { %4298 = vmatpush3.bf16.msra.mxu0 %v5405_v37 }
 0x2a0   : > { %4418 = vmatpush3.bf16.msra.mxu1 %v5411_v38  ;;  %4303 = vmatprep.subr.bf16.mxu0 %v5419_v39 }
 0x2a1   : > { %4423 = vmatprep.subr.bf16.mxu1 %v5425_v46 }
 0x2a2   : > { %4300 = vmatmul.mubr.msk.bf16.vlgmr.msra.gmra.mrb[28].mxu0 %vm1014_vm8, %v5569_v5 }
 0x2a3   : > { %4420 = vmatmul.mubr.msk.bf16.vlgmr.msra.gmra.mrb[28].mxu1 %vm1014_vm8, %v5569_v5  ;;  %4304 = vmatpush3.bf16.msra.mxu0 %v5419_v39 }
 0x2a4   : > { %4311 = vmatprep.mubr.msk.bf16.mxu0 %vm1014_vm8, %v5523_v56  ;;  %4424 = vmatpush3.bf16.msra.mxu1 %v5425_v46 }
 0x2a5   : > { %4431 = vmatprep.mubr.msk.bf16.mxu1 %vm1014_vm8, %v5523_v56  ;;  %4305 = vmatprep.subr.bf16.mxu0 %v5438_v48 }
 0x2a6   : > { %4425 = vmatprep.subr.bf16.mxu1 %v5445_v49 }
 0x2a7   : > { %4306 = vmatpush3.bf16.msra.mxu0 %v5438_v48 }
 0x2a8   : > { %4426 = vmatpush3.bf16.msra.mxu1 %v5445_v49  ;;  %4307 = vmatprep.subr.bf16.mxu0 %v5456_v28 }
 0x2a9   : > { %4427 = vmatprep.subr.bf16.mxu1 %v5464_v51 }
 0x2ab   : > { %4308 = vmatpush3.bf16.msra.mxu0 %v5456_v28 }
 0x2ac   : > { %4428 = vmatpush3.bf16.msra.mxu1 %v5464_v51  ;;  %4309 = vmatprep.subr.bf16.mxu0 %v5473_v52 }
 0x2ad   : > { %4429 = vmatprep.subr.bf16.mxu1 %v5479_v59 }
 0x2af   : > { %4310 = vmatpush3.bf16.msra.mxu0 %v5473_v52 }
 0x2b0   : > { %4430 = vmatpush3.bf16.msra.mxu1 %v5479_v59  ;;  %4315 = vmatprep.subr.bf16.mxu0 %v5488_v61 }
 0x2b1   : > { %4435 = vmatprep.subr.bf16.mxu1 %v5494_v4 }
 0x2b2   : > { %4312 = vmatmul.mubr.msk.bf16.vlgmr.msra.gmra.mrb[28].mxu0 %vm1014_vm8, %v5498_v50 }
 0x2b3   : > { %4432 = vmatmul.mubr.msk.bf16.vlgmr.msra.gmra.mrb[28].mxu1 %vm1014_vm8, %v5498_v50  ;;  %4316 = vmatpush3.bf16.msra.mxu0 %v5488_v61 }
 0x2b4   : > { %4323 = vmatprep.mubr.msk.bf16.mxu0 %vm1014_vm8, %v5592_v9  ;;  %4436 = vmatpush3.bf16.msra.mxu1 %v5494_v4 }
 0x2b5   : > { %4443 = vmatprep.mubr.msk.bf16.mxu1 %vm1014_vm8, %v5291_v14  ;;  %4317 = vmatprep.subr.bf16.mxu0 %v6016_v41 }
 0x2b6   : > { %4437 = vmatprep.subr.bf16.mxu1 %v6017_v42 }
 0x2b7   : > { %4318 = vmatpush3.bf16.msra.mxu0 %v6016_v41 }
 0x2b8   : > { %4438 = vmatpush3.bf16.msra.mxu1 %v6017_v42  ;;  %4319 = vmatprep.subr.bf16.mxu0 %v5528_v60 }
 0x2b9   : > { %4439 = vmatprep.subr.bf16.mxu1 %v6018_v43 }
 0x2bb   : > { %4320 = vmatpush3.bf16.msra.mxu0 %v5528_v60 }
 0x2bc   : > { %4440 = vmatpush3.bf16.msra.mxu1 %v6018_v43  ;;  %4321 = vmatprep.subr.bf16.mxu0 %v5545_v27 }
 0x2bd   : > { %4441 = vmatprep.subr.bf16.mxu1 %v5551_v33 }
 0x2bf   : > { %4322 = vmatpush3.bf16.msra.mxu0 %v5545_v27 }
 0x2c0   : > { %4442 = vmatpush3.bf16.msra.mxu1 %v5551_v33  ;;  %4327 = vmatprep.subr.bf16.mxu0 %v6019_v44  ;;  %v6028_v33 = vld [vmem:[#allocation16_spill] sm:$0xff] }
 0x2c1   : > { %4447 = vmatprep.subr.bf16.mxu1 %v6020_v11 }
 0x2c2   : > { %4324 = vmatmul.mubr.msk.bf16.vlgmr.msra.gmra.mrb[28].mxu0 %vm1014_vm8, %v5569_v5 }
 0x2c3   : > { %4444 = vmatmul.mubr.msk.bf16.vlgmr.msra.gmra.mrb[28].mxu1 %vm1014_vm8, %v6021_v12  ;;  %4328 = vmatpush3.bf16.msra.mxu0 %v6019_v44 }
 0x2c4   : > { %4335 = vmatprep.mubr.msk.bf16.mxu0 %vm1014_vm8, %v6022_v20  ;;  %4448 = vmatpush3.bf16.msra.mxu1 %v6020_v11 }
 0x2c5   : > { %4455 = vmatprep.mubr.msk.bf16.mxu1 %vm1014_vm8, %v6022_v20  ;;  %4329 = vmatprep.subr.bf16.mxu0 %v6023_v29 }
 0x2c6   : > { %4449 = vmatprep.subr.bf16.mxu1 %v6024_v54 }
 0x2c7   : > { %4330 = vmatpush3.bf16.msra.mxu0 %v6023_v29 }
 0x2c8   : > { %4450 = vmatpush3.bf16.msra.mxu1 %v6024_v54  ;;  %4331 = vmatprep.subr.bf16.mxu0 %v6025_v22 }
 0x2c9   : > { %4451 = vmatprep.subr.bf16.mxu1 %v6026_v24 }
 0x2cb   : > { %4332 = vmatpush3.bf16.msra.mxu0 %v6025_v22 }
 0x2cc   : > { %4452 = vmatpush3.bf16.msra.mxu1 %v6026_v24  ;;  %4333 = vmatprep.subr.bf16.mxu0 %v6027_v31 }
 0x2cd   : > { %4453 = vmatprep.subr.bf16.mxu1 %v6028_v33 }
 0x2cf   : > { %4334 = vmatpush3.bf16.msra.mxu0 %v6027_v31 }
 0x2d0   : > { %4454 = vmatpush3.bf16.msra.mxu1 %v6028_v33  ;;  %4339 = vmatprep.subr.bf16.mxu0 %v6029_v35 }
 0x2d1   : > { %4459 = vmatprep.subr.bf16.mxu1 %v6030_v53 }
 0x2d2   : > { %4336 = vmatmul.mubr.msk.bf16.vlgmr.msra.gmra.mrb[28].mxu0 %vm1014_vm8, %v6031_v55 }
 0x2d3   : > { %4456 = vmatmul.mubr.msk.bf16.vlgmr.msra.gmra.mrb[28].mxu1 %vm1014_vm8, %v6031_v55  ;;  %4340 = vmatpush3.bf16.msra.mxu0 %v6029_v35 }
 0x2d4   : > { %4347 = vmatprep.mubr.msk.bf16.mxu0 %vm1014_vm8, %v5291_v14  ;;  %4460 = vmatpush3.bf16.msra.mxu1 %v6030_v53 }
 0x2d5   : > { %4467 = vmatprep.mubr.msk.bf16.mxu1 %vm1014_vm8, %v5291_v14  ;;  %4341 = vmatprep.subr.bf16.mxu0 %v5646_v62 }
 0x2d6   : > { %4461 = vmatprep.subr.bf16.mxu1 %v6032_v57 }
 0x2d7   : > { %4342 = vmatpush3.bf16.msra.mxu0 %v5646_v62 }
 0x2d8   : > { %4462 = vmatpush3.bf16.msra.mxu1 %v6032_v57  ;;  %4343 = vmatprep.subr.bf16.mxu0 %v5664_v45 }
 0x2d9   : > { %4463 = vmatprep.subr.bf16.mxu1 %v6033_v58 }
 0x2db   : > { %4344 = vmatpush3.bf16.msra.mxu0 %v5664_v45 }
 0x2dc   : > { %4464 = vmatpush3.bf16.msra.mxu1 %v6033_v58  ;;  %4345 = vmatprep.subr.bf16.mxu0 %v5681_v21 }
 0x2dd   : > { %4465 = vmatprep.subr.bf16.mxu1 %v6034_v63 }
 0x2df   : > { %4346 = vmatpush3.bf16.msra.mxu0 %v5681_v21 }
 0x2e0   : > { %4466 = vmatpush3.bf16.msra.mxu1 %v6034_v63  ;;  %4351 = vmatprep.subr.bf16.mxu0 %v5695_v15 }
 0x2e2   : > { %4348 = vmatmul.mubr.msk.bf16.vlgmr.msra.gmra.mrb[28].mxu0 %vm1014_vm8, %v6021_v12 }
 0x2e3   : > { %4468 = vmatmul.mubr.msk.bf16.vlgmr.msra.gmra.mrb[28].mxu1 %vm1014_vm8, %v6021_v12  ;;  %4352 = vmatpush3.bf16.msra.mxu0 %v5695_v15 }
 0x2e4   : > { %4359 = vmatprep.mubr.msk.bf16.mxu0 %vm1014_vm8, %v6022_v20  ;;  %4353 = vmatprep.subr.bf16.mxu0 %v5705_v7 }
 0x2e7   : > { %4354 = vmatpush3.bf16.msra.mxu0 %v5705_v7 }
 0x2e8   : > { %4355 = vmatprep.subr.bf16.mxu0 %v5718_v34 }
 0x2eb   : > { %4356 = vmatpush3.bf16.msra.mxu0 %v5718_v34 }
 0x2ec   : > { %4357 = vmatprep.subr.bf16.mxu0 %v5730_v40 }
 0x2ef   : > { %4358 = vmatpush3.bf16.msra.mxu0 %v5730_v40 }
 0x2f2   : > { %4360 = vmatmul.mubr.msk.bf16.vlgmr.msra.gmra.mrb[28].mxu0 %vm1014_vm8, %v6031_v55 }
 0x326   : > { %v4253_v0 = vpop.f32.mrb[24].mxu1 }
 0x327   : > { %v2391_v10 = vpop.f32.mrb[25].mxu1 }
 0x328   : > { %v4254_v13 = vpop.f32.mrb[26].mxu1 }
 0x329   : > { %v2394_v14 = vpop.f32.mrb[27].mxu1 }
 0x335   : > { %v4145_v16 = vpop.f32.mrb[24].mxu0 }
 0x336   : > { %v3346_v17 = vmax.f32 %v4145_v16, %v4253_v0  ;;  %v1722_v18 = vpop.f32.mrb[25].mxu0 }
 0x337   : > { %v3344_v19 = vmax.f32 %v1722_v18, %v2391_v10  ;;  %v4146_v2 = vpop.f32.mrb[26].mxu0 }
 0x338   : > { %v1725_v1 = vpop.f32.mrb[27].mxu0 }
 0x339   : > { %v3345_v3 = vmax.f32 %v1725_v1, %v2394_v14 }
 0x3b6   : > { %v4469_v6 = vpop.f32.mrb[28].mxu1 }
 0x3b7   : > { %v3327_v23 = vpop.f32.mrb[29].mxu1 }
 0x3b8   : > { %v4470_v26 = vpop.f32.mrb[30].mxu1 }
 0x3b9   : > { %v3330_v30 = vpop.f32.mrb[31].mxu1 }
 0x3c5   : > { %v4361_v32 = vpop.f32.mrb[28].mxu0 }
 0x3c6   : > { %v3349_v36 = vmax.f32 %v4361_v32, %v4469_v6  ;;  %v2874_v8 = vpop.f32.mrb[29].mxu0 }
 0x3c7   : > { %v3347_v25 = vmax.f32 %v2874_v8, %v3327_v23  ;;  %v4362_v37 = vpop.f32.mrb[30].mxu0 }
 0x3c8   : > { %v3352_v38 = vmax.f32 %v3346_v17, %v3349_v36  ;;  %v2877_v39 = vpop.f32.mrb[31].mxu0 }
 0x3c9   : > { %v3350_v46 = vmax.f32 %v3344_v19, %v3347_v25  ;;  %v3348_v47 = vmax.f32 %v2877_v39, %v3330_v30 }
 0x3ca   : > { %v3355_v48 = vmax.f32 %v3352_v38, 0.0 }
 0x3cb   : > { %v3351_v49 = vmax.f32 %v3345_v3, %v3348_v47  ;;  %v3353_v51 = vmax.f32 %v3350_v46, 0.0 }
 0x3cc   : > { %v3817_v28 = vpack.c.bf16 %v3355_v48, %v3355_v48 }
 0x3cd   : > { %v3354_v52 = vmax.f32 %v3351_v49, 0.0 }
 0x3ce   : > { %3371 = vst [vmem:[%s170_s19 + $0x8] sm:$0xf] %v3817_v28 }
 0x3cf   : > { %v3821_v59 = vpack.c.bf16 %v3354_v52, %v3353_v51 }
 0x3d1   : > { %3822 = vst [vmem:[%s170_s19] sm:$0xff] %v3821_v59  }
 0x3d2 PF: > { %s13_s12 = sadd.s32 1, %s4755_s12  }
 0x3d3   : > { %p10_p4 = scmp.ge.s32.totalorder %s13_s12, 4  }
 0x3d5   :  { %12 = sbr.rel (!%p10_p4) target bundleno = 1 (0x1), region = 85 }

</bundles_post_ra>
